<compile_context>
chip_gen: v7x
topology: tpu7x:2x2x1
jax: 0.10.0
libtpu: 0.0.40
codegen_flags: <defaults>
</compile_context>

<pallas_src>
import functools

import jax
import jax.numpy as jnp
from jax.experimental import pallas as pl
from jax.experimental.pallas import tpu as pltpu


_NEG_BIG = -1e30  # acts as -inf in the softmax but keeps all arithmetic finite


def _round_up(x, m):
    return (x + m - 1) // m * m


# ----------------------------- Pallas kernel -------------------------------


def _adaptive_softmax_kernel(c0, head_pad, tail_meta, n_clusters,
                             occ_ref, ht_ref, t_ref, w_ref, out_ref):
    """Fused adaptive-softmax NLL for one token tile.

    occ_ref : (num_tiles * n_clusters,) int32 SMEM   per-tile tail occupancy
    ht_ref  : (D_aug, TB)        hidden^T tile (+ ones row for the bias column)
    t_ref   : (1, TB) int32      targets (lane-dense)
    w_ref   : (V_fused, D_aug)   fused weights with bias folded in as a column
    out_ref : (1, TB) f32        per-token NLL (lane-dense)
    """
    tile = pl.program_id(0)
    tgt = t_ref[...]                                        # (1, TB) int32

    # Single MXU matmul: vocab on sublanes, tokens on lanes, f32 accumulate.
    # Bias is the (D+1)-th contraction column (ones row in hidden^T).
    logits = jax.lax.dot_general(
        w_ref[...], ht_ref[...], (((1,), (0,)), ((), ())),
        preferred_element_type=jnp.float32)                 # (V_fused, TB)

    # ---- head segment: shortlist + one column per cluster (+ inert pad rows
    #      whose folded bias is -1e30).
    head = logits[:head_pad, :]                             # (head_pad, TB)
    m_h = jnp.max(head, axis=0, keepdims=True)              # (1, TB)
    lse_h = m_h + jnp.log(jnp.sum(jnp.exp(head - m_h), axis=0, keepdims=True))

    # Head row to pick: the target itself for shortlist tokens, the cluster
    # column for tail tokens (folds head-gather + cluster-logprob into one
    # gather; no (head_pad, TB) log-prob matrix is ever materialized).
    head_idx = tgt
    for i, (_, _, l_idx, r_idx) in enumerate(tail_meta, start=1):
        in_i = (tgt >= l_idx) & (tgt < r_idx)
        head_idx = jnp.where(in_i, c0 + i - 1, head_idx)

    rows_h = jax.lax.broadcasted_iota(jnp.int32, head.shape, 0)
    pick_h = jnp.sum(jnp.where(rows_h == head_idx, head, 0.0),
                     axis=0, keepdims=True)                 # (1, TB)
    out_ref[...] = lse_h - pick_h                           # -log p(head choice)

    # ---- tail clusters: add -log p(target | cluster) for member tokens only.
    # Gated on the scalar-prefetched per-tile occupancy, so a tile with no
    # tokens of cluster i skips its logsumexp (EUP work) entirely.
    for i, (off, size_pad, l_idx, r_idx) in enumerate(tail_meta):
        @pl.when(occ_ref[tile * n_clusters + i] > 0)
        def _(off=off, size_pad=size_pad, l_idx=l_idx, r_idx=r_idx):
            seg = logits[off:off + size_pad, :]             # (size_pad, TB)
            m_t = jnp.max(seg, axis=0, keepdims=True)
            lse_t = m_t + jnp.log(
                jnp.sum(jnp.exp(seg - m_t), axis=0, keepdims=True))
            rows_t = jax.lax.broadcasted_iota(jnp.int32, seg.shape, 0)
            pick_t = jnp.sum(jnp.where(rows_t == (tgt - l_idx), seg, 0.0),
                             axis=0, keepdims=True)
            in_i = (tgt >= l_idx) & (tgt < r_idx)
            out_ref[...] = out_ref[...] + jnp.where(in_i, lse_t - pick_t, 0.0)


# ------------------------------- wrapper ------------------------------------


def _build_fused_params(out_weight, out_bias, cluster_weight, cluster_bias,
                        cutoffs, compute_dtype):
    """Stack [head(shortlist+clusters) | pad | tail_1 | tail_2 ...] weights,
    then fold the bias in as an extra contraction column."""
    c0 = cutoffs[0]
    n_clusters = len(cutoffs) - 1
    D = out_weight.shape[1]

    seg_w, seg_b = [], []

    head_w = jnp.concatenate([out_weight[:c0], cluster_weight], axis=0)
    head_b = jnp.concatenate([out_bias[:c0], cluster_bias], axis=0)
    head_size = c0 + n_clusters
    head_pad = _round_up(head_size, 8)
    if head_pad > head_size:
        pad = head_pad - head_size
        head_w = jnp.concatenate([head_w, jnp.zeros((pad, D), head_w.dtype)], 0)
        head_b = jnp.concatenate(
            [head_b, jnp.full((pad,), _NEG_BIG, head_b.dtype)], 0)
    seg_w.append(head_w)
    seg_b.append(head_b)

    tail_meta = []
    offset = head_pad
    for i in range(1, n_clusters + 1):
        l_idx, r_idx = cutoffs[i - 1], cutoffs[i]
        size = r_idx - l_idx
        size_pad = _round_up(size, 8)
        w_i = out_weight[l_idx:r_idx]
        b_i = out_bias[l_idx:r_idx]
        if size_pad > size:
            pad = size_pad - size
            w_i = jnp.concatenate([w_i, jnp.zeros((pad, D), w_i.dtype)], 0)
            b_i = jnp.concatenate([b_i, jnp.full((pad,), _NEG_BIG, b_i.dtype)], 0)
        seg_w.append(w_i)
        seg_b.append(b_i)
        tail_meta.append((offset, size_pad, l_idx, r_idx))
        offset += size_pad

    w_fused = jnp.concatenate(seg_w, axis=0).astype(jnp.float32)        # (V_f, D)
    b_fused = jnp.concatenate(seg_b, axis=0).astype(jnp.float32)[:, None]

    # Fold bias as the (D+1)-th column; zero-pad contraction dim to 8 sublanes.
    # (-1e30 pad sentinel is representable in bf16 and stays inert.)
    d_aug = _round_up(D + 1, 8)
    w_aug = jnp.concatenate(
        [w_fused, b_fused,
         jnp.zeros((w_fused.shape[0], d_aug - D - 1), jnp.float32)], axis=1)
    w_aug = w_aug.astype(compute_dtype)                                 # (V_f, D_aug)
    return w_aug, head_pad, d_aug, tuple(tail_meta)


def projected_adaptive_log_softmax_nll(hidden, target, out_weight, out_bias,
                                       cluster_weight, cluster_bias, cutoffs,
                                       *, tile_b=256,
                                       compute_dtype=jnp.bfloat16):
    """Per-token NLL, equivalent to module.forward(...)[0] with keep_order=True."""
    B, D = hidden.shape
    c0 = cutoffs[0]
    n_clusters = len(cutoffs) - 1

    # TODO(synk): non-None out_projs (d_proj != d_embed projection) path not
    # implemented; this config ties projections so proj is None everywhere.
    w_aug, head_pad, d_aug, tail_meta = _build_fused_params(
        out_weight, out_bias, cluster_weight, cluster_bias, cutoffs,
        compute_dtype)
    v_fused = w_aug.shape[0]

    # tile_b=256 fills the 256-wide MXU output lanes on v6e/v7x; clamp so a
    # small batch doesn't over-pad (v5e's 128-wide MXU is full at 128 anyway).
    tile_b = min(tile_b, _round_up(B, 128))
    assert tile_b % 128 == 0, "tile_b must be a multiple of 128 (lane width)"
    num_tiles = pl.cdiv(B, tile_b)
    b_padded = num_tiles * tile_b
    # TODO(synk): at production B on v7x, keep num_tiles >= 2 (even) so the
    # "parallel" grid axis shards across both TensorCores.

    # hidden^T with an appended ones row (bias contraction column) + zero pad
    # rows up to d_aug; tokens land on the 128-lane axis.
    h_aug = jnp.concatenate(
        [hidden.T, jnp.ones((1, B), hidden.dtype),
         jnp.zeros((d_aug - D - 1, B), hidden.dtype)], axis=0)          # (D_aug, B)
    if b_padded > B:
        h_aug = jnp.pad(h_aug, ((0, 0), (0, b_padded - B)))
    h_aug = h_aug.astype(compute_dtype)
    # TODO(synk): for large B, measure whether taking hidden in natural (TB, D)
    # blocks and transposing in-kernel (XLU has slack) beats this wrapper-side
    # transpose+cast HBM pass.

    target_pad = target.astype(jnp.int32)
    if b_padded > B:
        target_pad = jnp.pad(target_pad, (0, b_padded - B))
    target_row = target_pad.reshape(1, b_padded)

    # Per-tile tail-cluster occupancy (scalar prefetch): tiles whose tokens are
    # all shortlist skip the tail logsumexp in-kernel via pl.when.
    t2 = target_pad.reshape(num_tiles, tile_b)
    occ_cols = []
    for i in range(1, n_clusters + 1):
        in_i = (t2 >= cutoffs[i - 1]) & (t2 < cutoffs[i])
        occ_cols.append(jnp.any(in_i, axis=1).astype(jnp.int32))
    occ = jnp.stack(occ_cols, axis=1).reshape(-1)          # (num_tiles*n_clusters,)

    kernel = functools.partial(_adaptive_softmax_kernel, c0, head_pad,
                               tail_meta, n_clusters)

    nll = pl.pallas_call(
        kernel,
        out_shape=jax.ShapeDtypeStruct((1, b_padded), jnp.float32),
        grid_spec=pltpu.PrefetchScalarGridSpec(
            num_scalar_prefetch=1,
            grid=(num_tiles,),
            in_specs=[
                pl.BlockSpec((d_aug, tile_b), lambda i, occ: (0, i)),   # hidden^T
                pl.BlockSpec((1, tile_b), lambda i, occ: (0, i)),       # targets
                # Constant fused weight block (bias folded in).
                # TODO(synk): at production vocab sizes add
                # pipeline_mode=pl.Buffered(1) here and an inner "arbitrary"
                # vocab grid axis (online softmax) to fit v7x's 64 MiB VMEM.
                pl.BlockSpec((v_fused, d_aug), lambda i, occ: (0, 0)),
            ],
            out_specs=pl.BlockSpec((1, tile_b), lambda i, occ: (0, i)),  # NLL
        ),
        compiler_params=pltpu.CompilerParams(
            dimension_semantics=("parallel",)),
    )(occ, h_aug, target_row, w_aug)

    return nll[0, :B]


# --------------------------- pure-JAX reference ------------------------------


def reference_nll(hidden, target, out_weight, out_bias,
                  cluster_weight, cluster_bias, cutoffs):
    c0 = cutoffs[0]
    head_w = jnp.concatenate([out_weight[:c0], cluster_weight], 0)
    head_b = jnp.concatenate([out_bias[:c0], cluster_bias], 0)
    head_logit = hidden @ head_w.T + head_b
    head_lp = jax.nn.log_softmax(head_logit, axis=-1)

    nll = jnp.zeros(hidden.shape[0], hidden.dtype)
    cutoff_values = [0] + list(cutoffs)
    for i in range(len(cutoff_values) - 1):
        l_idx, r_idx = cutoff_values[i], cutoff_values[i + 1]
        mask = (target >= l_idx) & (target < r_idx)
        if i == 0:
            nll_all = -jnp.take_along_axis(head_lp, target[:, None], axis=1)[:, 0]
        else:
            w_i = out_weight[l_idx:r_idx]
            b_i = out_bias[l_idx:r_idx]
            tail_lp = jax.nn.log_softmax(hidden @ w_i.T + b_i, axis=-1)
            local = jnp.clip(target - l_idx, 0, r_idx - l_idx - 1)
            nll_all = -(head_lp[:, c0 + i - 1]
                        + jnp.take_along_axis(tail_lp, local[:, None], axis=1)[:, 0])
        nll = jnp.where(mask, nll_all, nll)
    return nll


# ----------------------------------- main ------------------------------------


if __name__ == "__main__":
    n_token = 384
    cutoffs = [128, 256, 384]          # clean_cutoffs([128, 256], 384)
    d_embed = d_proj = 64
    B = 320                            # len * bsz tokens (not a tile multiple)

    key = jax.random.PRNGKey(0)
    k_h, k_t, k_t2, k_w, k_b, k_cw, k_cb = jax.random.split(key, 7)

    hidden = jax.random.normal(k_h, (B, d_proj), dtype=jnp.float32)
    target = jax.random.randint(k_t, (B,), 0, n_token, dtype=jnp.int32)
    # Make tokens >= 256 shortlist-only so the second tile exercises the
    # occupancy-gated tail-skip path.
    shortlist_tgt = jax.random.randint(k_t2, (B,), 0, cutoffs[0], dtype=jnp.int32)
    target = jnp.where(jnp.arange(B) >= 256, shortlist_tgt, target)

    # small random params (module zero-inits; random makes the softmax non-trivial)
    out_weight = 0.05 * jax.random.normal(k_w, (n_token, d_embed), jnp.float32)
    out_bias = 0.05 * jax.random.normal(k_b, (n_token,), jnp.float32)
    n_clusters = len(cutoffs) - 1
    cluster_weight = 0.05 * jax.random.normal(k_cw, (n_clusters, d_embed), jnp.float32)
    cluster_bias = 0.05 * jax.random.normal(k_cb, (n_clusters,), jnp.float32)

    nll = projected_adaptive_log_softmax_nll(
        hidden, target, out_weight, out_bias, cluster_weight, cluster_bias, cutoffs)
    nll = jax.block_until_ready(nll)

    nll_ref = jax.block_until_ready(reference_nll(
        hidden, target, out_weight, out_bias, cluster_weight, cluster_bias, cutoffs))

    assert nll.shape == (B,)
    assert jnp.allclose(nll, nll_ref, atol=3e-2, rtol=3e-2), (
        "mismatch vs reference: max abs err = %f"
        % float(jnp.max(jnp.abs(nll - nll_ref))))

    # TODO(synk): output_prediction_scores (full [B, n_token] log-probs) path is
    # not emitted; only the NLL (output_loss=True, keep_order=True) path is
    # implemented in the kernel.
    print("KERNEL_OK")
</pallas_src>

<mosaic_0001>
module attributes {stable_mosaic.version = 11 : i64} {
  func.func @_adaptive_softmax_kernel(%arg0: i32, %arg1: memref<4xi32, #tpu.memory_space<smem>>, %arg2: memref<72x256xbf16, #tpu.memory_space<vmem>>, %arg3: memref<1x256xi32, #tpu.memory_space<vmem>>, %arg4: memref<392x72xbf16, #tpu.memory_space<vmem>>, %arg5: memref<1x256xf32, #tpu.memory_space<vmem>>) attributes {dimension_semantics = [#tpu.dimension_semantics<parallel>], iteration_bounds = array<i64: 2>, scalar_prefetch = 1 : i64, scratch_operands = 0 : i64, tpu.core_type = #tpu.core_type<tc>, window_params = [{transform_indices = @transform_0, window_bounds = array<i64: 72, 256>}, {transform_indices = @transform_1, window_bounds = array<i64: 1, 256>}, {pipeline_mode = #tpu.pipeline_mode<synchronous>, transform_indices = @transform_2, window_bounds = array<i64: 392, 72>}, {transform_indices = @transform_3, window_bounds = array<i64: 1, 256>}]} {
    %c0 = arith.constant 0 : index
    %c0_0 = arith.constant 0 : index
    %0 = vector.load %arg3[%c0, %c0_0] : memref<1x256xi32, #tpu.memory_space<vmem>>, vector<1x256xi32>
    %c0_1 = arith.constant 0 : index
    %c0_2 = arith.constant 0 : index
    %1 = vector.load %arg4[%c0_1, %c0_2] : memref<392x72xbf16, #tpu.memory_space<vmem>>, vector<392x72xbf16>
    %c0_3 = arith.constant 0 : index
    %c0_4 = arith.constant 0 : index
    %2 = vector.load %arg2[%c0_3, %c0_4] : memref<72x256xbf16, #tpu.memory_space<vmem>>, vector<72x256xbf16>
    %cst = arith.constant dense<0.000000e+00> : vector<392x256xf32>
    %3 = tpu.matmul %1, %2, %cst {dimension_numbers = #tpu.dot_dimension_numbers<[1], [0], [0], [1], [0, 0, 1, 1], [], []>} : vector<392x72xbf16>, vector<72x256xbf16>, vector<392x256xf32> -> vector<392x256xf32>
    %4 = vector.extract_strided_slice %3 {offsets = [0, 0], sizes = [136, 256], strides = [1, 1]} : vector<392x256xf32> to vector<136x256xf32>
    %cst_5 = arith.constant dense<0xFF800000> : vector<256xf32>
    %5 = vector.multi_reduction <maximumf>, %4, %cst_5 [0] : vector<136x256xf32> to vector<256xf32>
    %6 = vector.shape_cast %5 : vector<256xf32> to vector<1x256xf32>
    %7 = vector.broadcast %6 : vector<1x256xf32> to vector<136x256xf32>
    %8 = arith.subf %4, %7 : vector<136x256xf32>
    %9 = math.exp %8 : vector<136x256xf32>
    %cst_6 = arith.constant dense<0.000000e+00> : vector<256xf32>
    %10 = vector.multi_reduction <add>, %9, %cst_6 [0] : vector<136x256xf32> to vector<256xf32>
    %11 = vector.shape_cast %10 : vector<256xf32> to vector<1x256xf32>
    %12 = math.log %11 : vector<1x256xf32>
    %13 = arith.addf %6, %12 : vector<1x256xf32>
    %c128_i32 = arith.constant 128 : i32
    %14 = vector.broadcast %c128_i32 : i32 to vector<1x256xi32>
    %15 = arith.cmpi sge, %0, %14 : vector<1x256xi32>
    %c256_i32 = arith.constant 256 : i32
    %16 = vector.broadcast %c256_i32 : i32 to vector<1x256xi32>
    %17 = arith.cmpi slt, %0, %16 : vector<1x256xi32>
    %18 = arith.andi %15, %17 : vector<1x256xi1>
    %c128_i32_7 = arith.constant 128 : i32
    %19 = vector.broadcast %c128_i32_7 : i32 to vector<1x256xi32>
    %20 = arith.select %18, %19, %0 : vector<1x256xi1>, vector<1x256xi32>
    %c256_i32_8 = arith.constant 256 : i32
    %21 = vector.broadcast %c256_i32_8 : i32 to vector<1x256xi32>
    %22 = arith.cmpi sge, %0, %21 : vector<1x256xi32>
    %c384_i32 = arith.constant 384 : i32
    %23 = vector.broadcast %c384_i32 : i32 to vector<1x256xi32>
    %24 = arith.cmpi slt, %0, %23 : vector<1x256xi32>
    %25 = arith.andi %22, %24 : vector<1x256xi1>
    %c129_i32 = arith.constant 129 : i32
    %26 = vector.broadcast %c129_i32 : i32 to vector<1x256xi32>
    %27 = arith.select %25, %26, %20 : vector<1x256xi1>, vector<1x256xi32>
    %28 = tpu.iota {dimensions = array<i32: 0>} : vector<136x256xi32>
    %29 = vector.broadcast %27 : vector<1x256xi32> to vector<136x256xi32>
    %30 = arith.cmpi eq, %28, %29 : vector<136x256xi32>
    %cst_9 = arith.constant 0.000000e+00 : f32
    %31 = vector.broadcast %cst_9 : f32 to vector<136x256xf32>
    %32 = arith.select %30, %4, %31 : vector<136x256xi1>, vector<136x256xf32>
    %cst_10 = arith.constant dense<0.000000e+00> : vector<256xf32>
    %33 = vector.multi_reduction <add>, %32, %cst_10 [0] : vector<136x256xf32> to vector<256xf32>
    %34 = vector.shape_cast %33 : vector<256xf32> to vector<1x256xf32>
    %35 = arith.subf %13, %34 : vector<1x256xf32>
    %c0_11 = arith.constant 0 : index
    %c0_12 = arith.constant 0 : index
    %36 = vector.load %arg5[%c0_11, %c0_12] : memref<1x256xf32, #tpu.memory_space<vmem>>, vector<1x256xf32>
    tpu.vector_store %arg5[%c0_11, %c0_12], %35 {strides = array<i32>} : memref<1x256xf32, #tpu.memory_space<vmem>>, vector<1x256xf32>,
    %c2_i32 = arith.constant 2 : i32
    %37 = arith.muli %arg0, %c2_i32 : i32
    %c0_i32 = arith.constant 0 : i32
    %38 = arith.addi %37, %c0_i32 : i32
    %39 = arith.index_cast %38 : i32 to index
    %40 = memref.load %arg1[%39] : memref<4xi32, #tpu.memory_space<smem>>
    %c0_i32_13 = arith.constant 0 : i32
    %41 = arith.cmpi sgt, %40, %c0_i32_13 : i32
    %42 = arith.extui %41 : i1 to i32
    %c0_i32_14 = arith.constant 0 : i32
    %43 = arith.cmpi ne, %42, %c0_i32_14 : i32
    scf.if %43 {
      %51 = vector.extract_strided_slice %3 {offsets = [136, 0], sizes = [128, 256], strides = [1, 1]} : vector<392x256xf32> to vector<128x256xf32>
      %cst_18 = arith.constant dense<0xFF800000> : vector<256xf32>
      %52 = vector.multi_reduction <maximumf>, %51, %cst_18 [0] : vector<128x256xf32> to vector<256xf32>
      %53 = vector.shape_cast %52 : vector<256xf32> to vector<1x256xf32>
      %54 = vector.broadcast %53 : vector<1x256xf32> to vector<128x256xf32>
      %55 = arith.subf %51, %54 : vector<128x256xf32>
      %56 = math.exp %55 : vector<128x256xf32>
      %cst_19 = arith.constant dense<0.000000e+00> : vector<256xf32>
      %57 = vector.multi_reduction <add>, %56, %cst_19 [0] : vector<128x256xf32> to vector<256xf32>
      %58 = vector.shape_cast %57 : vector<256xf32> to vector<1x256xf32>
      %59 = math.log %58 : vector<1x256xf32>
      %60 = arith.addf %53, %59 : vector<1x256xf32>
      %61 = tpu.iota {dimensions = array<i32: 0>} : vector<128x256xi32>
      %c128_i32_20 = arith.constant 128 : i32
      %62 = vector.broadcast %c128_i32_20 : i32 to vector<1x256xi32>
      %63 = arith.subi %0, %62 : vector<1x256xi32>
      %64 = vector.broadcast %63 : vector<1x256xi32> to vector<128x256xi32>
      %65 = arith.cmpi eq, %61, %64 : vector<128x256xi32>
      %cst_21 = arith.constant 0.000000e+00 : f32
      %66 = vector.broadcast %cst_21 : f32 to vector<128x256xf32>
      %67 = arith.select %65, %51, %66 : vector<128x256xi1>, vector<128x256xf32>
      %cst_22 = arith.constant dense<0.000000e+00> : vector<256xf32>
      %68 = vector.multi_reduction <add>, %67, %cst_22 [0] : vector<128x256xf32> to vector<256xf32>
      %69 = vector.shape_cast %68 : vector<256xf32> to vector<1x256xf32>
      %c128_i32_23 = arith.constant 128 : i32
      %70 = vector.broadcast %c128_i32_23 : i32 to vector<1x256xi32>
      %71 = arith.cmpi sge, %0, %70 : vector<1x256xi32>
      %c256_i32_24 = arith.constant 256 : i32
      %72 = vector.broadcast %c256_i32_24 : i32 to vector<1x256xi32>
      %73 = arith.cmpi slt, %0, %72 : vector<1x256xi32>
      %74 = arith.andi %71, %73 : vector<1x256xi1>
      %c0_25 = arith.constant 0 : index
      %c0_26 = arith.constant 0 : index
      %75 = vector.load %arg5[%c0_25, %c0_26] : memref<1x256xf32, #tpu.memory_space<vmem>>, vector<1x256xf32>
      %76 = arith.subf %60, %69 : vector<1x256xf32>
      %cst_27 = arith.constant 0.000000e+00 : f32
      %77 = vector.broadcast %cst_27 : f32 to vector<1x256xf32>
      %78 = arith.select %74, %76, %77 : vector<1x256xi1>, vector<1x256xf32>
      %79 = arith.addf %75, %78 : vector<1x256xf32>
      %c0_28 = arith.constant 0 : index
      %c0_29 = arith.constant 0 : index
      %80 = vector.load %arg5[%c0_28, %c0_29] : memref<1x256xf32, #tpu.memory_space<vmem>>, vector<1x256xf32>
      tpu.vector_store %arg5[%c0_28, %c0_29], %79 {strides = array<i32>} : memref<1x256xf32, #tpu.memory_space<vmem>>, vector<1x256xf32>,
    } else {
    }
    %c2_i32_15 = arith.constant 2 : i32
    %44 = arith.muli %arg0, %c2_i32_15 : i32
    %c1_i32 = arith.constant 1 : i32
    %45 = arith.addi %44, %c1_i32 : i32
    %46 = arith.index_cast %45 : i32 to index
    %47 = memref.load %arg1[%46] : memref<4xi32, #tpu.memory_space<smem>>
    %c0_i32_16 = arith.constant 0 : i32
    %48 = arith.cmpi sgt, %47, %c0_i32_16 : i32
    %49 = arith.extui %48 : i1 to i32
    %c0_i32_17 = arith.constant 0 : i32
    %50 = arith.cmpi ne, %49, %c0_i32_17 : i32
    scf.if %50 {
      %51 = vector.extract_strided_slice %3 {offsets = [264, 0], sizes = [128, 256], strides = [1, 1]} : vector<392x256xf32> to vector<128x256xf32>
      %cst_18 = arith.constant dense<0xFF800000> : vector<256xf32>
      %52 = vector.multi_reduction <maximumf>, %51, %cst_18 [0] : vector<128x256xf32> to vector<256xf32>
      %53 = vector.shape_cast %52 : vector<256xf32> to vector<1x256xf32>
      %54 = vector.broadcast %53 : vector<1x256xf32> to vector<128x256xf32>
      %55 = arith.subf %51, %54 : vector<128x256xf32>
      %56 = math.exp %55 : vector<128x256xf32>
      %cst_19 = arith.constant dense<0.000000e+00> : vector<256xf32>
      %57 = vector.multi_reduction <add>, %56, %cst_19 [0] : vector<128x256xf32> to vector<256xf32>
      %58 = vector.shape_cast %57 : vector<256xf32> to vector<1x256xf32>
      %59 = math.log %58 : vector<1x256xf32>
      %60 = arith.addf %53, %59 : vector<1x256xf32>
      %61 = tpu.iota {dimensions = array<i32: 0>} : vector<128x256xi32>
      %c256_i32_20 = arith.constant 256 : i32
      %62 = vector.broadcast %c256_i32_20 : i32 to vector<1x256xi32>
      %63 = arith.subi %0, %62 : vector<1x256xi32>
      %64 = vector.broadcast %63 : vector<1x256xi32> to vector<128x256xi32>
      %65 = arith.cmpi eq, %61, %64 : vector<128x256xi32>
      %cst_21 = arith.constant 0.000000e+00 : f32
      %66 = vector.broadcast %cst_21 : f32 to vector<128x256xf32>
      %67 = arith.select %65, %51, %66 : vector<128x256xi1>, vector<128x256xf32>
      %cst_22 = arith.constant dense<0.000000e+00> : vector<256xf32>
      %68 = vector.multi_reduction <add>, %67, %cst_22 [0] : vector<128x256xf32> to vector<256xf32>
      %69 = vector.shape_cast %68 : vector<256xf32> to vector<1x256xf32>
      %c256_i32_23 = arith.constant 256 : i32
      %70 = vector.broadcast %c256_i32_23 : i32 to vector<1x256xi32>
      %71 = arith.cmpi sge, %0, %70 : vector<1x256xi32>
      %c384_i32_24 = arith.constant 384 : i32
      %72 = vector.broadcast %c384_i32_24 : i32 to vector<1x256xi32>
      %73 = arith.cmpi slt, %0, %72 : vector<1x256xi32>
      %74 = arith.andi %71, %73 : vector<1x256xi1>
      %c0_25 = arith.constant 0 : index
      %c0_26 = arith.constant 0 : index
      %75 = vector.load %arg5[%c0_25, %c0_26] : memref<1x256xf32, #tpu.memory_space<vmem>>, vector<1x256xf32>
      %76 = arith.subf %60, %69 : vector<1x256xf32>
      %cst_27 = arith.constant 0.000000e+00 : f32
      %77 = vector.broadcast %cst_27 : f32 to vector<1x256xf32>
      %78 = arith.select %74, %76, %77 : vector<1x256xi1>, vector<1x256xf32>
      %79 = arith.addf %75, %78 : vector<1x256xf32>
      %c0_28 = arith.constant 0 : index
      %c0_29 = arith.constant 0 : index
      %80 = vector.load %arg5[%c0_28, %c0_29] : memref<1x256xf32, #tpu.memory_space<vmem>>, vector<1x256xf32>
      tpu.vector_store %arg5[%c0_28, %c0_29], %79 {strides = array<i32>} : memref<1x256xf32, #tpu.memory_space<vmem>>, vector<1x256xf32>,
    } else {
    }
    return
  }
  func.func @transform_0(%arg0: i32, %arg1: memref<4xi32, #tpu.memory_space<smem>>) -> (i32, i32) {
    %c0_i32 = arith.constant 0 : i32
    %c0_i32_0 = arith.constant 0 : i32
    return %c0_i32, %arg0 : i32, i32
  }
  func.func @transform_1(%arg0: i32, %arg1: memref<4xi32, #tpu.memory_space<smem>>) -> (i32, i32) {
    %c0_i32 = arith.constant 0 : i32
    %c0_i32_0 = arith.constant 0 : i32
    return %c0_i32, %arg0 : i32, i32
  }
  func.func @transform_2(%arg0: i32, %arg1: memref<4xi32, #tpu.memory_space<smem>>) -> (i32, i32) {
    %c0_i32 = arith.constant 0 : i32
    %c0_i32_0 = arith.constant 0 : i32
    %c0_i32_1 = arith.constant 0 : i32
    return %c0_i32, %c0_i32_0 : i32, i32
  }
  func.func @transform_3(%arg0: i32, %arg1: memref<4xi32, #tpu.memory_space<smem>>) -> (i32, i32) {
    %c0_i32 = arith.constant 0 : i32
    %c0_i32_0 = arith.constant 0 : i32
    return %c0_i32, %arg0 : i32, i32
  }
}

</mosaic_0001>

<bundles_post_ra>
// kernel: tpu_custom_call.1
= control target key start
LH: loop header
LB: loop body
LE: loop exit
PB: predicated region body
PF: predicated region fallthrough
CT: control target
= control target key end

     0   :  { %s4002_s0 = inlined_call_operand.vmem [shape: s32[4], index: 0, kind: input, shape index: {}]   ;;  %s4003_s1 = inlined_call_operand.vmem [shape: bf16[72,512], index: 1, kind: input, shape index: {}]   ;;  %s4004_s2 = inlined_call_operand.vmem [shape: s32[1,512], index: 2, kind: input, shape index: {}]   ;;  %s4005_s3 = inlined_call_operand.vmem [shape: bf16[392,72], index: 3, kind: input, shape index: {}]   ;;  %s4006_s4 = inlined_call_operand.hbm [shape: f32[1,512], index: 4, kind: output, shape index: {}]  }
   0x1   :  { %s9_s17 = sshll.u32 %s4002_s0, 4  ;;  %s10_s17 = int_to_ptr.vmem [resolvable:$true] %s9_s17 }
   0x2   :  { %s2356_s18 = scalar_lea.vmem %s10_s17, 16  ;;  %p2361_p1 = scmp.lt.s32.totalorder %s10_s17, %s10_s17 }
   0x3   :  { %p2357_p0 = scmp.ne.s32.totalorder %s10_s17, %s2356_s18  ;;  %p2362_p2 = scmp.lt.s32.totalorder %s2356_s18, %s2356_s18 }
   0x5   :  { %p2363_p3 = por %p2362_p2, %p2361_p1 }
   0x7   :  { %p2364_p4 = pnand %p2363_p3, %p2357_p0 }
   0x9   :  { %2367 = shalt.err (!%p2364_p4)  }
   0xa   :  { %s2434_s19 = smov [#allocation3]  }
   0xb   :  { %12 = dma.vmem_to_smem %s10_s17, 16, %s2434_s19, [#allocation2] }
   0xc   :  { %2412 = dma.done.wait [#allocation2], 16 }
   0xd   :  { %2413 = vsyncadd [#allocation2], 4294967280 }
   0xe   :  { %14 = sfence }
   0xf   :  { %15 = vsyncpa [#allocation6], 0 }
  0x10   :  { %17 = vsyncpa [#allocation6 + $0x1], 0  ;;  %s2466_s20 = smov 0   ;;  %s2468_s21 = smov 0  }
  0x11   :  { %s2470_s0 = smov 0   ;;  %s2472_s22 = smov 0  }
  0x12 LB: > { %s2487_s23 = sadd.s32 4294967295, %s2432_s22   ;;  %s1974_s24 = sadd.s32 4294967294, %s2432_s22   ;;  %s2432_s22 = sphi %s2472_s22, %s4330_s22   ;;  %s2428_s0 = sphi %s2470_s0, %s4329_s0   ;;  %s2424_s21 = sphi %s2468_s21, %s4328_s21   ;;  %s2420_s20 = sphi %s2466_s20, %s4327_s20  }
  0x13   : > { %s2491_s25 = sadd.s32 1, %s2432_s22   ;;  %s30_s26 = sadd.s32 1, %s2428_s0 }
  0x14   : > { %s27_s27 = ssub.s32 %s2432_s22, %s2491_s25  ;;  %p37_p5 = scmp.ne.s32.totalorder %s2428_s0, %s2424_s21 }
  0x15   : > { %p28_p6 = scmp.eq.s32.totalorder %s27_s27, 0  ;;  %p38_p7 = scmp.eq.s32.totalorder %s2432_s22, 0 }
  0x16   : > { %p114_p8 = scmp.eq.s32.totalorder %s2487_s23, 1  ;;  %p119_p9 = scmp.ne.s32.totalorder %s2424_s21, %s2420_s20 }
  0x17   : > { %s2503_s28 = scalar_select %p28_p6, %s2428_s0, %s30_s26  }
  0x18   : > { %p39_p10 = por %p38_p7, %p37_p5  ;;  %p2505_p11 = por %p114_p8, %p37_p5 }
  0x19   : > { %p120_p12 = scmp.eq.s32.totalorder %s1974_s24, 1  ;;  %p1976_p0 = scmp.ge.s32.totalorder %s2432_s22, 2 }
  0x1b   : > { %p2509_p13 = por %p120_p12, %p119_p9  ;;  %139 = sbr.rel (%p1976_p0) target bundleno = 43 (0x2b), region = 20 }
  0x22   : > { %142 = sbr.rel (!%p39_p10) target bundleno = 43 (0x2b), region = 24  ;;  %s144_s5 = sand.u32 (%p39_p10), 1, %s2428_s0  }
  0x23   : > { %s2053_s6 = sshll.u32 (%p39_p10), %s2432_s22, 3  ;;  %s2065_s7 = smul.u32 (%p39_p10), 72, %s144_s5 }
  0x24   : > { %s149_s10 = scalar_lea.vmem (%p39_p10), %s4003_s1, %s2053_s6 }
  0x25   : > { %v193_v0 = vld [vmem:[%s149_s10] sm:$0xff] (%p39_p10)  ;;  %v195_v1 = vld [vmem:[%s149_s10 + $0x10] sm:$0xff] (%p39_p10)  ;;  %s146_s11 = scalar_lea.vmem (%p39_p10), [#allocation4], %s2065_s7 }
  0x26   : > { %v197_v2 = vld [vmem:[%s149_s10 + $0x20] sm:$0xff] (%p39_p10)  ;;  %v199_v3 = vld [vmem:[%s149_s10 + $0x30] sm:$0xff] (%p39_p10)  ;;  %194 = vst [vmem:[%s146_s11] sm:$0xff] (%p39_p10), %v193_v0  ;;  %196 = vst [vmem:[%s146_s11 + $0x8] sm:$0xff] (%p39_p10), %v195_v1 }
  0x27   : > { %v201_v4 = vld [vmem:[%s149_s10 + $0x40] sm:$0xff] (%p39_p10)  ;;  %v203_v5 = vld [vmem:[%s149_s10 + $0x50] sm:$0xff] (%p39_p10)  ;;  %198 = vst [vmem:[%s146_s11 + $0x10] sm:$0xff] (%p39_p10), %v197_v2  ;;  %200 = vst [vmem:[%s146_s11 + $0x18] sm:$0xff] (%p39_p10), %v199_v3 }
  0x28   : > { %202 = vst [vmem:[%s146_s11 + $0x20] sm:$0xff] (%p39_p10), %v201_v4  ;;  %204 = vst [vmem:[%s146_s11 + $0x28] sm:$0xff] (%p39_p10), %v203_v5  ;;  %v205_v6 = vld [vmem:[%s149_s10 + $0x60] sm:$0xff] (%p39_p10)  ;;  %v207_v7 = vld [vmem:[%s149_s10 + $0x70] sm:$0xff] (%p39_p10) }
  0x29   : > { %v209_v8 = vld [vmem:[%s149_s10 + $0x80] sm:$0xff]  ;;  %206 = vst [vmem:[%s146_s11 + $0x30] sm:$0xff] %v205_v6  ;;  %208 = vst [vmem:[%s146_s11 + $0x38] sm:$0xff] %v207_v7 }
  0x2a   : > { %210 = vst [vmem:[%s146_s11 + $0x40] sm:$0xff] %v209_v8 }
  0x2b PF: > { %p1979_p1 = scmp.ge.s32.totalorder %s2432_s22, 1  ;;  %p223_p2 = scmp.lt.s32.totalorder %s2432_s22, 3 }
  0x2d   : > { %p224_p3 = pnand %p1979_p1, %p223_p2 }
  0x2f   : > { %227 = sbr.rel (%p224_p3) target bundleno = 743 (0x2e7), region = 66 }
  0x36   : > { %s2524_s12 = sand.u32 1, %s2424_s21   ;;  %v2435_v9 = vmov 0   ;;  %vm568_vm0 = vcmask 1043456   ;;  %v2123_v22 = vld [vmem:[%s4005_s3] sm:$0xff]   ;;  %v2132_v23 = vld [vmem:[%s4005_s3 + $0x68] sm:$0xff]   ;;  %vm492_vm1 = vcmask 588800   ;;  %v4007_v48 = vlaneseq }
  0x37   : > { %s2066_s13 = smul.u32 72, %s2524_s12  ;;  %607 = vmatprep.mubr.bf16.mxu0 %v2435_v9  ;;  %737 = vmatprep.mubr.bf16.mxu1 %v2435_v9  ;;  %v2124_v24 = vld [vmem:[%s4005_s3 + $0x8] sm:$0xff]   ;;  %v2133_v25 = vld [vmem:[%s4005_s3 + $0x70] sm:$0xff]   ;;  %v2134_v27 = vld [vmem:[%s4005_s3 + $0x78] sm:$0xff]   ;;  %v4114_v49 = vmov 0  ;;  %v4118_v52 = vmov 0 }
  0x38   : > { %v2125_v26 = vld [vmem:[%s4005_s3 + $0x10] sm:$0xff]   ;;  %v2126_v28 = vld [vmem:[%s4005_s3 + $0x18] sm:$0xff]   ;;  %v2135_v29 = vld [vmem:[%s4005_s3 + $0x80] sm:$0xff]   ;;  %v2674_v50 = vshrl.u32 %v4007_v48, 7  ;;  %s1980_s24 = sshll.u32 %s2524_s12, 1 }
  0x39   : > { %s232_s14 = scalar_lea.vmem [#allocation4], %s2066_s13  ;;  %v2127_v30 = vld [vmem:[%s4005_s3 + $0x20] sm:$0xff]   ;;  %v2136_v31 = vld [vmem:[%s4005_s3 + $0x88] sm:$0xff]   ;;  %v2137_v33 = vld [vmem:[%s4005_s3 + $0x90] sm:$0xff]   ;;  %s3166_s26 = scalar_lea.vmem [#allocation5], %s1980_s24 }
  0x3a   : > { %v2109_v10 = vld [vmem:[%s232_s14 + $0x4] ss:$8 sps:$4 sm:$0xff]   ;;  %v2111_v11 = vld [vmem:[%s232_s14] ss:$8 sps:$4 sm:$0xff]   ;;  %v2112_v12 = vld [vmem:[%s232_s14 + $0x14] ss:$8 sps:$4 sm:$0xff]  }
  0x3b   : > { %575 = vmatprep.subr.bf16.mxu0 %v2109_v10  ;;  %2055 = vmatprep.subr.bf16.mxu1 %v2109_v10  ;;  %v2114_v13 = vld [vmem:[%s232_s14 + $0x10] ss:$8 sps:$4 sm:$0xff]   ;;  %v2115_v14 = vld [vmem:[%s232_s14 + $0x24] ss:$8 sps:$4 sm:$0xff]   ;;  %v2117_v15 = vld [vmem:[%s232_s14 + $0x20] ss:$8 sps:$4 sm:$0xff]  }
  0x3c   : > { %576 = vmatpush1.bf16.msra.mxu0 %v2111_v11  ;;  %2060 = vmatpush1.bf16.msra.mxu1 %v2111_v11  ;;  %v2118_v16 = vld [vmem:[%s232_s14 + $0x34] ss:$8 sps:$4 sm:$0xff]   ;;  %v323_v17 = vld [vmem:[%s232_s14 + $0x40] sm:$0xff]  ;;  %v2120_v18 = vld [vmem:[%s232_s14 + $0x30] ss:$8 sps:$4 sm:$0xff]   ;;  %s2653_s14 = sshll.u32 %s2487_s23, 1 }
  0x3d   : > { %577 = vmatprep.subr.bf16.mxu0 %v2112_v12  ;;  %2056 = vmatprep.subr.bf16.mxu1 %v2112_v12  ;;  %v2016_v19 = vcombine.high %v323_v17, %v323_v17  ;;  %v2015_v20 = vcombine.low %v323_v17, %v323_v17  ;;  %v2128_v32 = vld [vmem:[%s4005_s3 + $0x28] sm:$0xff]   ;;  %v2129_v34 = vld [vmem:[%s4005_s3 + $0x30] sm:$0xff]   ;;  %v2138_v35 = vld [vmem:[%s4005_s3 + $0x98] sm:$0xff]   ;;  %s2656_s15 = sld [smem:[#allocation3 + %s2653_s14]]  ;;  %p259_p4 = scmp.lt.s32.totalorder %s2653_s14, 3  ;;  %4117 = vst [vmem:[#allocation11_spill] sm:$0xff] %v2674_v50 }
  0x3e   : > { %v2130_v36 = vld [vmem:[%s4005_s3 + $0x38] sm:$0xff]   ;;  %v2139_v37 = vld [vmem:[%s4005_s3 + $0xa0] sm:$0xff]   ;;  %v2141_v39 = vld [vmem:[%s4005_s3 + $0xa8] sm:$0xff]   ;;  %v2684_v53 = vsub.s32 0, %v2674_v50  ;;  %v2689_v55 = vsub.s32 1, %v2674_v50  ;;  %v2695_v57 = vadd.s32 8, %v2674_v50 }
  0x3f   : > { %v570_v21 = vsel %vm568_vm0, %v2015_v20, 0  ;;  %v2131_v38 = vld [vmem:[%s4005_s3 + $0x40] sm:$0xff]   ;;  %v2140_v40 = vld [vmem:[%s4005_s3 + $0x48] sm:$0xff]   ;;  %v2143_v41 = vld [vmem:[%s4005_s3 + $0xb0] sm:$0xff]   ;;  %s260_s16 = scalar_select %p259_p4, %s2653_s14, 3  ;;  %v2719_v0 = vadd.s32 16, %v2674_v50 }
  0x40   : > { %578 = vmatpush1.bf16.msra.mxu0 %v2114_v13  ;;  %2061 = vmatpush1.bf16.msra.mxu1 %v2114_v13  ;;  %v2142_v42 = vld [vmem:[%s4005_s3 + $0x50] sm:$0xff]   ;;  %v2145_v43 = vld [vmem:[%s4005_s3 + $0xb8] sm:$0xff]   ;;  %v2147_v45 = vld [vmem:[%s4005_s3 + $0xc0] ss:$0 sps:$4 sm:$0xff]   ;;  %4121 = vst [vmem:[#allocation13_spill] sm:$0xff] %v2684_v53 }
  0x41   : > { %579 = vmatprep.subr.bf16.mxu0 %v2115_v14  ;;  %2057 = vmatprep.subr.bf16.mxu1 %v2115_v14  ;;  %v2144_v44 = vld [vmem:[%s4005_s3 + $0x58] sm:$0xff]   ;;  %v2146_v46 = vld [vmem:[%s4005_s3 + $0x60] sm:$0xff]   ;;  %s261_s19 = scalar_lea.vmem %s4004_s2, %s260_s16  ;;  %4122 = vst [vmem:[#allocation14_spill] sm:$0xff] %v2689_v55  ;;  %4123 = vst [vmem:[#allocation15_spill] sm:$0xff] %v2695_v57 }
  0x42   : > { %v2663_v47 = vld [vmem:[%s261_s19] sm:$0x3]  ;;  %4124 = vst [vmem:[#allocation16_spill] sm:$0xff] %v2719_v0 }
  0x43   : > { %4113 = vst [vmem:[#allocation9_spill] sm:$0xff] %v2663_v47  ;;  %vm1052_vm2 = vcmp.ge.s32.totalorder %v2663_v47, 128  ;;  %vm1053_vm3 = vcmp.lt.s32.totalorder %v2663_v47, 256  ;;  %vm1056_vm5 = vcmp.ge.s32.totalorder %v2663_v47, 256  ;;  %vm1057_vm6 = vcmp.lt.s32.totalorder %v2663_v47, 384  ;;  %p2044_p5 = scmp.le.s32.totalorder %s2656_s15, 0 }
  0x44   : > { %580 = vmatpush1.bf16.msra.mxu0 %v2117_v15  ;;  %2062 = vmatpush1.bf16.msra.mxu1 %v2117_v15  ;;  %vm2667_vm4 = vmand %vm1052_vm2, %vm1053_vm3 }
  0x45   : > { %581 = vmatprep.subr.bf16.mxu0 %v2118_v16  ;;  %2058 = vmatprep.subr.bf16.mxu1 %v2118_v16  ;;  %v4115_v49 = vsel %vm2667_vm4, 4294967295, %v4114_v49  ;;  %v1055_v51 = vsel %vm2667_vm4, 128, %v2663_v47  ;;  %vm2679_vm7 = vmand %vm1056_vm5, %vm1057_vm6 }
  0x46   : > { %4116 = vst [vmem:[#allocation10_spill] sm:$0xff] %v4115_v49  ;;  %v4119_v52 = vsel %vm2679_vm7, 4294967295, %v4118_v52  ;;  %v1059_v54 = vsel %vm2679_vm7, 129, %v1055_v51 }
  0x47   : > { %4120 = vst [vmem:[#allocation12_spill] sm:$0xff] %v4119_v52  ;;  %v2692_v56 = vrot.slane %v1059_v54, %v2684_v53  ;;  %v2698_v58 = vrot.slane %v1059_v54, %v2689_v55  ;;  %v2964_v55 = vadd.s32 120, %v2674_v50 }
  0x48   : > { %582 = vmatpush1.bf16.msra.mxu0 %v2120_v18  ;;  %2063 = vmatpush1.bf16.msra.mxu1 %v2120_v18 }
  0x49   : > { %2017 = vmatprep.subr.msk.bf16.mxu0 %vm568_vm0, %v2016_v19  ;;  %2059 = vmatprep.subr.msk.bf16.mxu1 %vm568_vm0, %v2016_v19  ;;  %vm1086_vm8 = vcmp.eq.s32.totalorder %v2674_v50, %v2692_v56  ;;  %vm1088_vm9 = vcmp.eq.s32.totalorder %v2695_v57, %v2692_v56  ;;  %vm1087_vm10 = vcmp.eq.s32.totalorder %v2674_v50, %v2698_v58 }
  0x4a   : > { %vm1089_vm11 = vcmp.eq.s32.totalorder %v2695_v57, %v2698_v58  ;;  %vm1090_vm12 = vcmp.eq.s32.totalorder %v2719_v0, %v2692_v56  ;;  %vm1091_vm13 = vcmp.eq.s32.totalorder %v2719_v0, %v2698_v58  ;;  %4162 = vst [vmem:[#allocation54_spill] sm:$0xff] %v2964_v55 }
  0x4c   : > { %584 = vmatpush1.bf16.msra.mxu0 %v570_v21  ;;  %2064 = vmatpush1.bf16.msra.mxu1 %v570_v21  ;;  %v2759_v21 = vadd.s32 32, %v2674_v50 }
  0x4e   : > { %4129 = vst [vmem:[#allocation21_spill] sm:$0xff] %v2759_v21  ;;  %vm1094_vm0 = vcmp.eq.s32.totalorder %v2759_v21, %v2692_v56 }
  0x4f   : > { %2018 = vmatmul.mubr.msk.bf16.vlgmr.msra.gmra.mrb[0].mxu0 %vm492_vm1, %v2123_v22  ;;  %2031 = vmatmul.mubr.msk.bf16.vlgmr.msra.gmra.mrb[0].mxu1 %vm492_vm1, %v2132_v23 }
  0x50   : > { %617 = vmatprep.mubr.bf16.mxu0 %v2435_v9  ;;  %747 = vmatprep.mubr.bf16.mxu1 %v2435_v9 }
  0x57   : > { %2019 = vmatmul.mubr.msk.bf16.gmra.mrb[4].mxu0 %vm492_vm1, %v2124_v24  ;;  %2032 = vmatmul.mubr.msk.bf16.gmra.mrb[4].mxu1 %vm492_vm1, %v2133_v25 }
  0x58   : > { %627 = vmatprep.mubr.bf16.mxu0 %v2435_v9  ;;  %757 = vmatprep.mubr.bf16.mxu1 %v2435_v9 }
  0x5f   : > { %2020 = vmatmul.mubr.msk.bf16.gmra.mrb[8].mxu0 %vm492_vm1, %v2125_v26  ;;  %2033 = vmatmul.mubr.msk.bf16.gmra.mrb[8].mxu1 %vm492_vm1, %v2134_v27 }
  0x60   : > { %637 = vmatprep.mubr.bf16.mxu0 %v2435_v9  ;;  %767 = vmatprep.mubr.bf16.mxu1 %v2435_v9 }
  0x67   : > { %2021 = vmatmul.mubr.msk.bf16.gmra.mrb[12].mxu0 %vm492_vm1, %v2126_v28  ;;  %2034 = vmatmul.mubr.msk.bf16.gmra.mrb[12].mxu1 %vm492_vm1, %v2135_v29 }
  0x68   : > { %647 = vmatprep.mubr.bf16.mxu0 %v2435_v9  ;;  %777 = vmatprep.mubr.bf16.mxu1 %v2435_v9 }
  0x6f   : > { %2022 = vmatmul.mubr.msk.bf16.gmra.mrb[16].mxu0 %vm492_vm1, %v2127_v30  ;;  %2035 = vmatmul.mubr.msk.bf16.gmra.mrb[16].mxu1 %vm492_vm1, %v2136_v31  ;;  %v2774_v31 = vadd.s32 40, %v2674_v50 }
  0x70   : > { %657 = vmatprep.mubr.bf16.mxu0 %v2435_v9  ;;  %787 = vmatprep.mubr.bf16.mxu1 %v2435_v9 }
  0x71   : > { %4132 = vst [vmem:[#allocation24_spill] sm:$0xff] %v2774_v31  ;;  %vm1096_vm2 = vcmp.eq.s32.totalorder %v2774_v31, %v2692_v56  ;;  %vm1097_vm3 = vcmp.eq.s32.totalorder %v2774_v31, %v2698_v58 }
  0x77   : > { %2023 = vmatmul.mubr.msk.bf16.gmra.mrb[20].mxu0 %vm492_vm1, %v2128_v32  ;;  %2036 = vmatmul.mubr.msk.bf16.gmra.mrb[20].mxu1 %vm492_vm1, %v2137_v33 }
  0x78   : > { %667 = vmatprep.mubr.bf16.mxu0 %v2435_v9  ;;  %797 = vmatprep.mubr.bf16.mxu1 %v2435_v9 }
  0x7f   : > { %2024 = vmatmul.mubr.msk.bf16.gmra.mrb[24].mxu0 %vm492_vm1, %v2129_v34  ;;  %2037 = vmatmul.mubr.msk.bf16.gmra.mrb[24].mxu1 %vm492_vm1, %v2138_v35 }
  0x80   : > { %677 = vmatprep.mubr.bf16.mxu0 %v2435_v9  ;;  %807 = vmatprep.mubr.bf16.mxu1 %v2435_v9 }
  0x87   : > { %2025 = vmatmul.mubr.msk.bf16.gmra.mrb[28].mxu0 %vm492_vm1, %v2130_v36  ;;  %2038 = vmatmul.mubr.msk.bf16.gmra.mrb[28].mxu1 %vm492_vm1, %v2139_v37 }
  0x88   : > { %687 = vmatprep.mubr.bf16.mxu0 %v2435_v9  ;;  %817 = vmatprep.mubr.bf16.mxu1 %v2435_v9 }
  0x8f   : > { %2026 = vmatmul.mubr.msk.bf16.gmra.mrb[32].mxu0 %vm492_vm1, %v2131_v38  ;;  %2039 = vmatmul.mubr.msk.bf16.gmra.mrb[32].mxu1 %vm492_vm1, %v2141_v39 }
  0x90   : > { %697 = vmatprep.mubr.bf16.mxu0 %v2435_v9  ;;  %827 = vmatprep.mubr.bf16.mxu1 %v2435_v9 }
  0x97   : > { %2027 = vmatmul.mubr.msk.bf16.gmra.mrb[36].mxu0 %vm492_vm1, %v2140_v40  ;;  %2040 = vmatmul.mubr.msk.bf16.gmra.mrb[36].mxu1 %vm492_vm1, %v2143_v41 }
  0x98   : > { %707 = vmatprep.mubr.bf16.mxu0 %v2435_v9  ;;  %837 = vmatprep.mubr.bf16.mxu1 %v2435_v9 }
  0x9f   : > { %2028 = vmatmul.mubr.msk.bf16.gmra.mrb[40].mxu0 %vm492_vm1, %v2142_v42  ;;  %2041 = vmatmul.mubr.msk.bf16.gmra.mrb[40].mxu1 %vm492_vm1, %v2145_v43  ;;  %v2799_v43 = vadd.s32 48, %v2674_v50 }
  0xa0   : > { %717 = vmatprep.mubr.bf16.mxu0 %v2435_v9  ;;  %847 = vmatprep.mubr.bf16.mxu1 %v2435_v9 }
  0xa1   : > { %4135 = vst [vmem:[#allocation27_spill] sm:$0xff] %v2799_v43  ;;  %vm1098_vm5 = vcmp.eq.s32.totalorder %v2799_v43, %v2692_v56  ;;  %vm1099_vm6 = vcmp.eq.s32.totalorder %v2799_v43, %v2698_v58 }
  0xa7   : > { %2029 = vmatmul.mubr.msk.bf16.gmra.mrb[44].mxu0 %vm492_vm1, %v2144_v44  ;;  %2042 = vmatmul.mubr.msk.bf16.gmra.mrb[44].mxu1 %vm492_vm1, %v2147_v45 }
  0xa8   : > { %727 = vmatprep.mubr.bf16.mxu0 %v2435_v9  ;;  %v2732_v9 = vadd.s32 24, %v2674_v50 }
  0xaa   : > { %4126 = vst [vmem:[#allocation18_spill] sm:$0xff] %v2732_v9  ;;  %vm1092_vm14 = vcmp.eq.s32.totalorder %v2732_v9, %v2692_v56  ;;  %vm1093_vm15 = vcmp.eq.s32.totalorder %v2732_v9, %v2698_v58 }
  0xaf   : > { %2030 = vmatmul.mubr.msk.bf16.gmra.mrb[48].mxu0 %vm492_vm1, %v2146_v46  ;;  %vm1095_vm1 = vcmp.eq.s32.totalorder %v2759_v21, %v2698_v58  ;;  %v2926_v21 = vadd.s32 104, %v2674_v50 }
  0xb1   : > { %4156 = vst [vmem:[#allocation48_spill] sm:$0xff] %v2926_v21 }
 0x122   : > { %v2700_v59 = vpop.f32.mrb[0].mxu0  ;;  %v2706_v60 = vpop.f32.mrb[0].mxu1 }
 0x123   : > { %v2708_v61 = vpop.f32.mrb[1].mxu0  ;;  %v2714_v62 = vpop.f32.mrb[1].mxu1  ;;  %v1120_v2 = vsel %vm1086_vm8, %v2700_v59, 0.0 }
 0x124   : > { %v2716_v63 = vpop.f32.mrb[2].mxu0  ;;  %v2721_v1 = vpop.f32.mrb[2].mxu1  ;;  %v1121_v6 = vsel %vm1087_vm10, %v2708_v61, 0.0 }
 0x125   : > { %v1122_v3 = vsel %vm1088_vm9, %v2716_v63, 0.0  ;;  %v2725_v4 = vpop.f32.mrb[3].mxu0  ;;  %v2727_v5 = vpop.f32.mrb[3].mxu1 }
 0x126   : > { %4125 = vst [vmem:[#allocation17_spill] sm:$0xff] %v2727_v5  ;;  %v1154_v7 = vadd.f32 %v1122_v3, %v1120_v2  ;;  %v1123_v8 = vsel %vm1089_vm11, %v2725_v4, 0.0 }
 0x127   : > { %v1176_v10 = vadd.f32 %v1123_v8, %v1121_v6  ;;  %v2812_v8 = vadd.s32 56, %v2674_v50 }
 0x129   : > { %4138 = vst [vmem:[#allocation30_spill] sm:$0xff] %v2812_v8  ;;  %vm1100_vm8 = vcmp.eq.s32.totalorder %v2812_v8, %v2692_v56  ;;  %vm1101_vm9 = vcmp.eq.s32.totalorder %v2812_v8, %v2698_v58 }
 0x12a   : > { %v2738_v11 = vpop.f32.mrb[4].mxu0  ;;  %v2742_v12 = vpop.f32.mrb[4].mxu1 }
 0x12b   : > { %4127 = vst [vmem:[#allocation19_spill] sm:$0xff] %v2742_v12  ;;  %v856_v13 = vmax.f32 %v2700_v59, %v2738_v11  ;;  %v1124_v14 = vsel %vm1090_vm12, %v2738_v11, 0.0  ;;  %v2747_v15 = vpop.f32.mrb[5].mxu0  ;;  %v2751_v16 = vpop.f32.mrb[5].mxu1 }
 0x12c   : > { %4128 = vst [vmem:[#allocation20_spill] sm:$0xff] %v2751_v16  ;;  %v1155_v17 = vadd.f32 %v1154_v7, %v1124_v14  ;;  %v878_v18 = vmax.f32 %v2708_v61, %v2747_v15  ;;  %v1125_v19 = vsel %vm1091_vm13, %v2747_v15, 0.0  ;;  %v2756_v20 = vpop.f32.mrb[6].mxu0  ;;  %v2761_v22 = vpop.f32.mrb[6].mxu1 }
 0x12d   : > { %4130 = vst [vmem:[#allocation22_spill] sm:$0xff] %v2761_v22  ;;  %v1177_v23 = vadd.f32 %v1176_v10, %v1125_v19  ;;  %v857_v24 = vmax.f32 %v2716_v63, %v2756_v20  ;;  %v1126_v25 = vsel %vm1092_vm14, %v2756_v20, 0.0  ;;  %v2766_v26 = vpop.f32.mrb[7].mxu0  ;;  %v2768_v27 = vpop.f32.mrb[7].mxu1 }
 0x12e   : > { %4131 = vst [vmem:[#allocation23_spill] sm:$0xff] %v2768_v27  ;;  %v1156_v28 = vadd.f32 %v1155_v17, %v1126_v25  ;;  %v879_v29 = vmax.f32 %v2725_v4, %v2766_v26  ;;  %v1127_v30 = vsel %vm1093_vm15, %v2766_v26, 0.0 }
 0x12f   : > { %v1178_v32 = vadd.f32 %v1177_v23, %v1127_v30  ;;  %v2837_v30 = vadd.s32 64, %v2674_v50 }
 0x131   : > { %4141 = vst [vmem:[#allocation33_spill] sm:$0xff] %v2837_v30  ;;  %vm1102_vm10 = vcmp.eq.s32.totalorder %v2837_v30, %v2692_v56  ;;  %vm1103_vm11 = vcmp.eq.s32.totalorder %v2837_v30, %v2698_v58  ;;  %v2888_v30 = vadd.s32 88, %v2674_v50 }
 0x132   : > { %v2780_v33 = vpop.f32.mrb[8].mxu0  ;;  %v2784_v34 = vpop.f32.mrb[8].mxu1 }
 0x133   : > { %4133 = vst [vmem:[#allocation25_spill] sm:$0xff] %v2784_v34  ;;  %v858_v35 = vmax.f32 %v856_v13, %v2780_v33  ;;  %v1128_v36 = vsel %vm1094_vm0, %v2780_v33, 0.0  ;;  %v2788_v37 = vpop.f32.mrb[9].mxu0  ;;  %v2792_v38 = vpop.f32.mrb[9].mxu1  ;;  %4150 = vst [vmem:[#allocation42_spill] sm:$0xff] %v2888_v30  ;;  %vm1108_vm0 = vcmp.eq.s32.totalorder %v2888_v30, %v2692_v56 }
 0x134   : > { %4134 = vst [vmem:[#allocation26_spill] sm:$0xff] %v2792_v38  ;;  %v1157_v39 = vadd.f32 %v1156_v28, %v1128_v36  ;;  %v880_v40 = vmax.f32 %v878_v18, %v2788_v37  ;;  %v1129_v41 = vsel %vm1095_vm1, %v2788_v37, 0.0  ;;  %v2796_v42 = vpop.f32.mrb[10].mxu0  ;;  %v2801_v44 = vpop.f32.mrb[10].mxu1  ;;  %vm1109_vm1 = vcmp.eq.s32.totalorder %v2888_v30, %v2698_v58 }
 0x135   : > { %4136 = vst [vmem:[#allocation28_spill] sm:$0xff] %v2801_v44  ;;  %v1179_v45 = vadd.f32 %v1178_v32, %v1129_v41  ;;  %v859_v46 = vmax.f32 %v857_v24, %v2796_v42  ;;  %v1130_v51 = vsel %vm1096_vm2, %v2796_v42, 0.0  ;;  %v2805_v54 = vpop.f32.mrb[11].mxu0  ;;  %v2807_v2 = vpop.f32.mrb[11].mxu1 }
 0x136   : > { %4137 = vst [vmem:[#allocation29_spill] sm:$0xff] %v2807_v2  ;;  %v1158_v3 = vadd.f32 %v1157_v39, %v1130_v51  ;;  %v881_v6 = vmax.f32 %v879_v29, %v2805_v54  ;;  %v1131_v7 = vsel %vm1097_vm3, %v2805_v54, 0.0 }
 0x137   : > { %v1180_v10 = vadd.f32 %v1179_v45, %v1131_v7  ;;  %v2850_v7 = vadd.s32 72, %v2674_v50 }
 0x139   : > { %4144 = vst [vmem:[#allocation36_spill] sm:$0xff] %v2850_v7  ;;  %vm1104_vm12 = vcmp.eq.s32.totalorder %v2850_v7, %v2692_v56  ;;  %vm1105_vm13 = vcmp.eq.s32.totalorder %v2850_v7, %v2698_v58 }
 0x13a   : > { %v2818_v13 = vpop.f32.mrb[12].mxu0  ;;  %v2822_v14 = vpop.f32.mrb[12].mxu1 }
 0x13b   : > { %4139 = vst [vmem:[#allocation31_spill] sm:$0xff] %v2822_v14  ;;  %v860_v17 = vmax.f32 %v858_v35, %v2818_v13  ;;  %v1132_v18 = vsel %vm1098_vm5, %v2818_v13, 0.0  ;;  %v2826_v19 = vpop.f32.mrb[13].mxu0  ;;  %v2830_v23 = vpop.f32.mrb[13].mxu1  ;;  %vm1112_vm5 = vcmp.eq.s32.totalorder %v2926_v21, %v2692_v56 }
 0x13c   : > { %4140 = vst [vmem:[#allocation32_spill] sm:$0xff] %v2830_v23  ;;  %v1159_v24 = vadd.f32 %v1158_v3, %v1132_v18  ;;  %v882_v25 = vmax.f32 %v880_v40, %v2826_v19  ;;  %v1133_v28 = vsel %vm1099_vm6, %v2826_v19, 0.0  ;;  %v2834_v29 = vpop.f32.mrb[14].mxu0  ;;  %v2839_v32 = vpop.f32.mrb[14].mxu1  ;;  %vm1113_vm6 = vcmp.eq.s32.totalorder %v2926_v21, %v2698_v58 }
 0x13d   : > { %4142 = vst [vmem:[#allocation34_spill] sm:$0xff] %v2839_v32  ;;  %v1181_v35 = vadd.f32 %v1180_v10, %v1133_v28  ;;  %v861_v36 = vmax.f32 %v859_v46, %v2834_v29  ;;  %v1134_v39 = vsel %vm1100_vm8, %v2834_v29, 0.0  ;;  %v2843_v41 = vpop.f32.mrb[15].mxu0  ;;  %v2845_v45 = vpop.f32.mrb[15].mxu1 }
 0x13e   : > { %4143 = vst [vmem:[#allocation35_spill] sm:$0xff] %v2845_v45  ;;  %v1160_v51 = vadd.f32 %v1159_v24, %v1134_v39  ;;  %v883_v40 = vmax.f32 %v881_v6, %v2843_v41  ;;  %v1135_v3 = vsel %vm1101_vm9, %v2843_v41, 0.0  ;;  %v2875_v45 = vadd.s32 80, %v2674_v50 }
 0x13f   : > { %v1182_v18 = vadd.f32 %v1181_v35, %v1135_v3 }
 0x140   : > { %4147 = vst [vmem:[#allocation39_spill] sm:$0xff] %v2875_v45  ;;  %vm1106_vm14 = vcmp.eq.s32.totalorder %v2875_v45, %v2692_v56  ;;  %vm1107_vm15 = vcmp.eq.s32.totalorder %v2875_v45, %v2698_v58 }
 0x142   : > { %v2856_v46 = vpop.f32.mrb[16].mxu0  ;;  %v2860_v10 = vpop.f32.mrb[16].mxu1 }
 0x143   : > { %4145 = vst [vmem:[#allocation37_spill] sm:$0xff] %v2860_v10  ;;  %v862_v6 = vmax.f32 %v860_v17, %v2856_v46  ;;  %v1136_v24 = vsel %vm1102_vm10, %v2856_v46, 0.0  ;;  %v2864_v28 = vpop.f32.mrb[17].mxu0  ;;  %v2868_v35 = vpop.f32.mrb[17].mxu1  ;;  %vm1116_vm10 = vcmp.eq.s32.totalorder %v2964_v55, %v2692_v56 }
 0x144   : > { %4146 = vst [vmem:[#allocation38_spill] sm:$0xff] %v2868_v35  ;;  %v1161_v39 = vadd.f32 %v1160_v51, %v1136_v24  ;;  %v884_v3 = vmax.f32 %v882_v25, %v2864_v28  ;;  %v1137_v48 = vsel %vm1103_vm11, %v2864_v28, 0.0  ;;  %v2872_v52 = vpop.f32.mrb[18].mxu0  ;;  %v2877_v17 = vpop.f32.mrb[18].mxu1  ;;  %vm1117_vm11 = vcmp.eq.s32.totalorder %v2964_v55, %v2698_v58 }
 0x145   : > { %4148 = vst [vmem:[#allocation40_spill] sm:$0xff] %v2877_v17  ;;  %v1183_v10 = vadd.f32 %v1182_v18, %v1137_v48  ;;  %v863_v32 = vmax.f32 %v861_v36, %v2872_v52  ;;  %v1138_v49 = vsel %vm1104_vm12, %v2872_v52, 0.0  ;;  %v2881_v7 = vpop.f32.mrb[19].mxu0  ;;  %v2883_v35 = vpop.f32.mrb[19].mxu1 }
 0x146   : > { %4149 = vst [vmem:[#allocation41_spill] sm:$0xff] %v2883_v35  ;;  %v1162_v51 = vadd.f32 %v1161_v39, %v1138_v49  ;;  %v885_v25 = vmax.f32 %v883_v40, %v2881_v7  ;;  %v1139_v24 = vsel %vm1105_vm13, %v2881_v7, 0.0 }
 0x147   : > { %v1184_v8 = vadd.f32 %v1183_v10, %v1139_v24 }
 0x14a   : > { %v2894_v48 = vpop.f32.mrb[20].mxu0  ;;  %v2898_v49 = vpop.f32.mrb[20].mxu1 }
 0x14b   : > { %4151 = vst [vmem:[#allocation43_spill] sm:$0xff] %v2898_v49  ;;  %v864_v36 = vmax.f32 %v862_v6, %v2894_v48  ;;  %v1140_v40 = vsel %vm1106_vm14, %v2894_v48, 0.0  ;;  %v2902_v18 = vpop.f32.mrb[21].mxu0  ;;  %v2906_v10 = vpop.f32.mrb[21].mxu1  ;;  %v2913_v49 = vadd.s32 96, %v2674_v50 }
 0x14c   : > { %4152 = vst [vmem:[#allocation44_spill] sm:$0xff] %v2906_v10  ;;  %v1163_v39 = vadd.f32 %v1162_v51, %v1140_v40  ;;  %v886_v24 = vmax.f32 %v884_v3, %v2902_v18  ;;  %v1141_v35 = vsel %vm1107_vm15, %v2902_v18, 0.0  ;;  %v2910_v17 = vpop.f32.mrb[22].mxu0  ;;  %v2915_v6 = vpop.f32.mrb[22].mxu1 }
 0x14d   : > { %4153 = vst [vmem:[#allocation45_spill] sm:$0xff] %v2913_v49  ;;  %4154 = vst [vmem:[#allocation46_spill] sm:$0xff] %v2915_v6  ;;  %v1185_v45 = vadd.f32 %v1184_v8, %v1141_v35  ;;  %v865_v43 = vmax.f32 %v863_v32, %v2910_v17  ;;  %v1142_v31 = vsel %vm1108_vm0, %v2910_v17, 0.0  ;;  %v2919_v30 = vpop.f32.mrb[23].mxu0  ;;  %v2921_v10 = vpop.f32.mrb[23].mxu1  ;;  %vm1110_vm2 = vcmp.eq.s32.totalorder %v2913_v49, %v2692_v56 }
 0x14e   : > { %4155 = vst [vmem:[#allocation47_spill] sm:$0xff] %v2921_v10  ;;  %v1164_v51 = vadd.f32 %v1163_v39, %v1142_v31  ;;  %v887_v3 = vmax.f32 %v885_v25, %v2919_v30  ;;  %v1143_v40 = vsel %vm1109_vm1, %v2919_v30, 0.0  ;;  %vm1111_vm3 = vcmp.eq.s32.totalorder %v2913_v49, %v2698_v58 }
 0x14f   : > { %v1186_v9 = vadd.f32 %v1185_v45, %v1143_v40 }
 0x152   : > { %v2932_v8 = vpop.f32.mrb[24].mxu0  ;;  %v2936_v31 = vpop.f32.mrb[24].mxu1 }
 0x153   : > { %4157 = vst [vmem:[#allocation49_spill] sm:$0xff] %v2936_v31  ;;  %v866_v32 = vmax.f32 %v864_v36, %v2932_v8  ;;  %v1144_v35 = vsel %vm1110_vm2, %v2932_v8, 0.0  ;;  %v2940_v25 = vpop.f32.mrb[25].mxu0  ;;  %v2944_v45 = vpop.f32.mrb[25].mxu1  ;;  %v2951_v31 = vadd.s32 112, %v2674_v50 }
 0x154   : > { %4158 = vst [vmem:[#allocation50_spill] sm:$0xff] %v2944_v45  ;;  %v1165_v39 = vadd.f32 %v1164_v51, %v1144_v35  ;;  %v888_v40 = vmax.f32 %v886_v24, %v2940_v25  ;;  %v1145_v10 = vsel %vm1111_vm3, %v2940_v25, 0.0  ;;  %v2948_v6 = vpop.f32.mrb[26].mxu0  ;;  %v2953_v36 = vpop.f32.mrb[26].mxu1 }
 0x155   : > { %4159 = vst [vmem:[#allocation51_spill] sm:$0xff] %v2951_v31  ;;  %4160 = vst [vmem:[#allocation52_spill] sm:$0xff] %v2953_v36  ;;  %v1187_v49 = vadd.f32 %v1186_v9, %v1145_v10  ;;  %v867_v0 = vmax.f32 %v865_v43, %v2948_v6  ;;  %v1146_v57 = vsel %vm1112_vm5, %v2948_v6, 0.0  ;;  %v2957_v21 = vpop.f32.mrb[27].mxu0  ;;  %v2959_v45 = vpop.f32.mrb[27].mxu1  ;;  %vm1114_vm8 = vcmp.eq.s32.totalorder %v2951_v31, %v2692_v56 }
 0x156   : > { %4161 = vst [vmem:[#allocation53_spill] sm:$0xff] %v2959_v45  ;;  %v1166_v51 = vadd.f32 %v1165_v39, %v1146_v57  ;;  %v889_v24 = vmax.f32 %v887_v3, %v2957_v21  ;;  %v1147_v35 = vsel %vm1113_vm6, %v2957_v21, 0.0  ;;  %vm1115_vm9 = vcmp.eq.s32.totalorder %v2951_v31, %v2698_v58 }
 0x157   : > { %v1188_v53 = vadd.f32 %v1187_v49, %v1147_v35 }
 0x15a   : > { %v2970_v9 = vpop.f32.mrb[28].mxu0  ;;  %v2974_v57 = vpop.f32.mrb[28].mxu1 }
 0x15b   : > { %4163 = vst [vmem:[#allocation55_spill] sm:$0xff] %v2974_v57  ;;  %v868_v43 = vmax.f32 %v866_v32, %v2970_v9  ;;  %v1148_v10 = vsel %vm1114_vm8, %v2970_v9, 0.0  ;;  %v2978_v3 = vpop.f32.mrb[29].mxu0  ;;  %v2982_v49 = vpop.f32.mrb[29].mxu1  ;;  %v1077_v57 = vadd.s32 128, %v2674_v50 }
 0x15c   : > { %4164 = vst [vmem:[#allocation56_spill] sm:$0xff] %v2982_v49  ;;  %v1167_v39 = vadd.f32 %v1166_v51, %v1148_v10  ;;  %v890_v35 = vmax.f32 %v888_v40, %v2978_v3  ;;  %v1149_v45 = vsel %vm1115_vm9, %v2978_v3, 0.0  ;;  %v2986_v36 = vpop.f32.mrb[30].mxu0  ;;  %v2989_v31 = vpop.f32.mrb[30].mxu1 }
 0x15d   : > { %4165 = vst [vmem:[#allocation57_spill] sm:$0xff] %v2989_v31  ;;  %v1189_v32 = vadd.f32 %v1188_v53, %v1149_v45  ;;  %v869_v23 = vmax.f32 %v867_v0, %v2986_v36  ;;  %v1150_v2 = vsel %vm1116_vm10, %v2986_v36, 0.0  ;;  %v2993_v14 = vpop.f32.mrb[31].mxu0  ;;  %v2995_v55 = vpop.f32.mrb[31].mxu1  ;;  %vm1118_vm12 = vcmp.eq.s32.totalorder %v1077_v57, %v2692_v56 }
 0x15e   : > { %4166 = vst [vmem:[#allocation58_spill] sm:$0xff] %v2995_v55  ;;  %v1168_v51 = vadd.f32 %v1167_v39, %v1150_v2  ;;  %v891_v40 = vmax.f32 %v889_v24, %v2993_v14  ;;  %v1151_v10 = vsel %vm1117_vm11, %v2993_v14, 0.0  ;;  %vm1119_vm13 = vcmp.eq.s32.totalorder %v1077_v57, %v2698_v58 }
 0x15f   : > { %v1190_v49 = vadd.f32 %v1189_v32, %v1151_v10 }
 0x162   : > { %v3001_v31 = vpop.f32.mrb[32].mxu0  ;;  %v3003_v53 = vpop.f32.mrb[32].mxu1 }
 0x163   : > { %4167 = vst [vmem:[#allocation59_spill] sm:$0xff] %v3003_v53  ;;  %v870_v0 = vmax.f32 %v868_v43, %v3001_v31  ;;  %v1152_v45 = vsel %vm1118_vm12, %v3001_v31, 0.0  ;;  %v3007_v44 = vpop.f32.mrb[33].mxu0  ;;  %v3009_v2 = vpop.f32.mrb[33].mxu1 }
 0x164   : > { %4168 = vst [vmem:[#allocation60_spill] sm:$0xff] %v3009_v2  ;;  %v3011_v24 = vadd.f32 %v1168_v51, %v1152_v45  ;;  %v892_v39 = vmax.f32 %v890_v35, %v3007_v44  ;;  %v1153_v56 = vsel %vm1119_vm13, %v3007_v44, 0.0  ;;  %v3015_v32 = vpop.f32.mrb[34].mxu0  ;;  %v3017_v58 = vpop.f32.mrb[34].mxu1 }
 0x165   : > { %4169 = vst [vmem:[#allocation61_spill] sm:$0xff] %v3017_v58  ;;  %v871_v57 = vmax.f32 %v870_v0, %v869_v23  ;;  %v3019_v10 = vadd.f32 %v1190_v49, %v1153_v56  ;;  %v3021_v43 = vpop.f32.mrb[35].mxu0  ;;  %v3023_v55 = vpop.f32.mrb[35].mxu1 }
 0x166   : > { %4170 = vst [vmem:[#allocation62_spill] sm:$0xff] %v3023_v55  ;;  %v893_v53 = vmax.f32 %v892_v39, %v891_v40 }
 0x167   : > { %v872_v47 = vrot.slane %v871_v57, 4 }
 0x168   : > { %v894_v51 = vrot.slane %v893_v53, 4 }
 0x169   : > { %v873_v2 = vmax.f32 %v871_v57, %v872_v47 }
 0x16a   : > { %v3025_v45 = vpop.f32.mrb[36].mxu0  ;;  %v3027_v35 = vpop.f32.mrb[36].mxu1  ;;  %v895_v47 = vmax.f32 %v893_v53, %v894_v51 }
 0x16b   : > { %4171 = vst [vmem:[#allocation63_spill] sm:$0xff] %v3027_v35  ;;  %v874_v38 = vrot.slane %v873_v2, 2  ;;  %v3029_v27 = vpop.f32.mrb[37].mxu0  ;;  %v3031_v34 = vpop.f32.mrb[37].mxu1 }
 0x16c   : > { %4172 = vst [vmem:[#allocation64_spill] sm:$0xff] %v3031_v34  ;;  %v3033_v23 = vpop.f32.mrb[38].mxu0  ;;  %v3035_v49 = vpop.f32.mrb[38].mxu1  ;;  %v896_v55 = vrot.slane %v895_v47, 2 }
 0x16d   : > { %4173 = vst [vmem:[#allocation65_spill] sm:$0xff] %v3035_v49  ;;  %v875_v0 = vmax.f32 %v873_v2, %v874_v38  ;;  %v3037_v56 = vpop.f32.mrb[39].mxu0  ;;  %v3039_v40 = vpop.f32.mrb[39].mxu1 }
 0x16e   : > { %4174 = vst [vmem:[#allocation66_spill] sm:$0xff] %v3039_v40 }
 0x16f   : > { %v876_v39 = vrot.slane %v875_v0, 1 }
 0x171   : > { %v3041_v57 = vmax.f32 %v875_v0, %v876_v39 }
 0x172   : > { %v3043_v35 = vpop.f32.mrb[40].mxu0  ;;  %v3045_v58 = vpop.f32.mrb[40].mxu1 }
 0x173   : > { %4175 = vst [vmem:[#allocation67_spill] sm:$0xff] %v3045_v58  ;;  %v900_v34 = vsub.f32 %v2700_v59, %v3041_v57  ;;  %v902_v49 = vsub.f32 %v2716_v63, %v3041_v57  ;;  %v3051_v38 = vpop.f32.mrb[41].mxu0  ;;  %v3053_v2 = vpop.f32.mrb[41].mxu1  ;;  %v904_v53 = vsub.f32 %v2738_v11, %v3041_v57  ;;  %v906_v59 = vsub.f32 %v2756_v20, %v3041_v57 }
 0x174   : > { %4176 = vst [vmem:[#allocation68_spill] sm:$0xff] %v3053_v2  ;;  %v3057_v51 = vpop.f32.mrb[42].mxu0  ;;  %v3059_v0 = vpop.f32.mrb[42].mxu1  ;;  %v897_v58 = vmax.f32 %v895_v47, %v896_v55  ;;  %v908_v2 = vsub.f32 %v2780_v33, %v3041_v57  ;;  %v910_v11 = vsub.f32 %v2796_v42, %v3041_v57 }
 0x175   : > { %4177 = vst [vmem:[#allocation69_spill] sm:$0xff] %v3059_v0  ;;  %v3061_v39 = vpop.f32.mrb[43].mxu0  ;;  %v3063_v40 = vpop.f32.mrb[43].mxu1  ;;  %v934_v63 = vmul.f32 1.442695, %v900_v34 }
 0x176   : > { %4178 = vst [vmem:[#allocation70_spill] sm:$0xff] %v3063_v40  ;;  %v938_v22 = vmul.f32 1.442695, %v902_v49  ;;  %v942_v16 = vmul.f32 1.442695, %v904_v53  ;;  %v898_v5 = vrot.slane %v897_v58, 1  ;;  %v912_v40 = vsub.f32 %v2818_v13, %v3041_v57 }
 0x177   : > { %2148 = vpow2.f32 %v934_v63  ;;  %v946_v0 = vmul.f32 1.442695, %v906_v59  ;;  %v950_v12 = vmul.f32 1.442695, %v908_v2  ;;  %v914_v49 = vsub.f32 %v2834_v29, %v3041_v57 }
 0x178   : > { %2150 = vpow2.f32 %v938_v22  ;;  %v954_v22 = vmul.f32 1.442695, %v910_v11  ;;  %v3083_v42 = vmax.f32 %v897_v58, %v898_v5  ;;  %v916_v53 = vsub.f32 %v2856_v46, %v3041_v57 }
 0x179   : > { %2152 = vpow2.f32 %v942_v16  ;;  %v958_v59 = vmul.f32 1.442695, %v912_v40  ;;  %v918_v63 = vsub.f32 %v2872_v52, %v3041_v57  ;;  %v962_v29 = vmul.f32 1.442695, %v914_v49 }
 0x17a   : > { %v3073_v20 = vpop.f32.mrb[44].mxu0  ;;  %v3075_v55 = vpop.f32.mrb[44].mxu1  ;;  %2154 = vpow2.f32 %v946_v0  ;;  %v901_v5 = vsub.f32 %v2708_v61, %v3083_v42  ;;  %v903_v0 = vsub.f32 %v2725_v4, %v3083_v42  ;;  %v966_v46 = vmul.f32 1.442695, %v916_v53 }
 0x17b   : > { %4179 = vst [vmem:[#allocation71_spill] sm:$0xff] %v3075_v55  ;;  %v3077_v34 = vpop.f32.mrb[45].mxu0  ;;  %v3079_v33 = vpop.f32.mrb[45].mxu1  ;;  %2156 = vpow2.f32 %v950_v12  ;;  %v970_v12 = vmul.f32 1.442695, %v918_v63  ;;  %v905_v52 = vsub.f32 %v2747_v15, %v3083_v42  ;;  %v922_v61 = vsub.f32 %v2910_v17, %v3041_v57 }
 0x17c   : > { %4180 = vst [vmem:[#allocation72_spill] sm:$0xff] %v3079_v33  ;;  %v3085_v47 = vpop.f32.mrb[46].mxu0  ;;  %v853_v13 = vpop.f32.mrb[46].mxu1  ;;  %2158 = vpow2.f32 %v954_v22  ;;  %v907_v33 = vsub.f32 %v2766_v26, %v3083_v42  ;;  %v924_v63 = vsub.f32 %v2932_v8, %v3041_v57  ;;  %v909_v17 = vsub.f32 %v2788_v37, %v3083_v42 }
 0x17d   : > { %v3087_v16 = vpop.f32.mrb[47].mxu0  ;;  %v854_v2 = vpop.f32.mrb[47].mxu1  ;;  %v920_v13 = vsub.f32 %v2894_v48, %v3041_v57  ;;  %2160 = vpow2.f32 %v958_v59  ;;  %v940_v48 = vmul.f32 1.442695, %v903_v0  ;;  %v926_v0 = vsub.f32 %v2948_v6, %v3041_v57 }
 0x17e   : > { %2162 = vpow2.f32 %v962_v29  ;;  %v936_v2 = vmul.f32 1.442695, %v901_v5  ;;  %v944_v29 = vmul.f32 1.442695, %v905_v52  ;;  %v911_v8 = vsub.f32 %v2805_v54, %v3083_v42 }
 0x17f   : > { %2164 = vpow2.f32 %v966_v46  ;;  %v974_v15 = vmul.f32 1.442695, %v920_v13  ;;  %v948_v13 = vmul.f32 1.442695, %v907_v33  ;;  %v982_v37 = vmul.f32 1.442695, %v924_v63 }
 0x180   : > { %2166 = vpow2.f32 %v970_v12  ;;  %v928_v12 = vsub.f32 %v2970_v9, %v3041_v57  ;;  %v952_v6 = vmul.f32 1.442695, %v909_v17  ;;  %v986_v54 = vmul.f32 1.442695, %v926_v0 }
 0x181   : > { %v2149_v58 = vpop.eup %2148  ;;  %2168 = vpow2.f32 %v936_v2  ;;  %v930_v2 = vsub.f32 %v2986_v36, %v3041_v57  ;;  %v915_v33 = vsub.f32 %v2843_v41, %v3083_v42  ;;  %v956_v9 = vmul.f32 1.442695, %v911_v8 }
 0x182   : > { %v2151_v11 = vpop.eup %2150  ;;  %v3101_v22 = vpop.f32.mrb[48].mxu0  ;;  %2170 = vpow2.f32 %v940_v48  ;;  %v932_v63 = vsub.f32 %v3001_v31, %v3041_v57  ;;  %v919_v41 = vsub.f32 %v2881_v7, %v3083_v42  ;;  %v923_v7 = vsub.f32 %v2919_v30, %v3083_v42 }
 0x183   : > { %v1002_v40 = vadd.f32 %v2151_v11, %v2149_v58  ;;  %v2153_v49 = vpop.eup %2152  ;;  %v3107_v59 = vpop.f32.mrb[49].mxu0  ;;  %2172 = vpow2.f32 %v974_v15 }
 0x184   : > { %v2155_v53 = vpop.eup %2154  ;;  %v3111_v58 = vpop.f32.mrb[50].mxu0  ;;  %2174 = vpow2.f32 %v944_v29  ;;  %v994_v29 = vmul.f32 1.442695, %v930_v2  ;;  %v998_v31 = vmul.f32 1.442695, %v932_v63 }
 0x185   : > { %v1003_v4 = vadd.f32 %v2153_v49, %v1002_v40  ;;  %v3115_v5 = vpop.f32.mrb[51].mxu0  ;;  %v2157_v26 = vpop.eup %2156  ;;  %v978_v40 = vmul.f32 1.442695, %v922_v61  ;;  %v980_v30 = vmul.f32 1.442695, %v923_v7 }
 0x186   : > { %v2159_v46 = vpop.eup %2158 }
 0x187   : > { %v1004_v11 = vadd.f32 %v2155_v53, %v1003_v4  ;;  %v913_v4 = vsub.f32 %v2826_v19, %v3083_v42  ;;  %v2161_v61 = vpop.eup %2160  ;;  %2176 = vpow2.f32 %v978_v40  ;;  %v990_v19 = vmul.f32 1.442695, %v928_v12 }
 0x188   : > { %2178 = vpow2.f32 %v948_v13  ;;  %v2163_v53 = vpop.eup %2162  ;;  %v964_v40 = vmul.f32 1.442695, %v915_v33 }
 0x189   : > { %v1005_v49 = vadd.f32 %v2157_v26, %v1004_v11  ;;  %2180 = vpow2.f32 %v982_v37  ;;  %v917_v11 = vsub.f32 %v2864_v28, %v3083_v42  ;;  %v960_v36 = vmul.f32 1.442695, %v913_v4  ;;  %v2165_v17 = vpop.eup %2164 }
 0x18a   : > { %2182 = vpow2.f32 %v952_v6  ;;  %v2167_v26 = vpop.eup %2166  ;;  %v921_v28 = vsub.f32 %v2902_v18, %v3083_v42  ;;  %v972_v6 = vmul.f32 1.442695, %v919_v41  ;;  %v925_v18 = vsub.f32 %v2940_v25, %v3083_v42 }
 0x18b   : > { %v1006_v52 = vadd.f32 %v2159_v46, %v1005_v49  ;;  %2184 = vpow2.f32 %v986_v54  ;;  %v2169_v49 = vpop.eup %2168  ;;  %v968_v46 = vmul.f32 1.442695, %v917_v11 }
 0x18c   : > { %2186 = vpow2.f32 %v956_v9  ;;  %v2171_v8 = vpop.eup %2170  ;;  %v976_v33 = vmul.f32 1.442695, %v921_v28  ;;  %v984_v25 = vmul.f32 1.442695, %v925_v18 }
 0x18d   : > { %v1007_v48 = vadd.f32 %v2161_v61, %v1006_v52  ;;  %2188 = vpow2.f32 %v990_v19  ;;  %v2173_v12 = vpop.eup %2172  ;;  %v1024_v37 = vadd.f32 %v2171_v8, %v2169_v49 }
 0x18e   : > { %2190 = vpow2.f32 %v960_v36  ;;  %v2175_v52 = vpop.eup %2174 }
 0x18f   : > { %v1008_v15 = vadd.f32 %v2163_v53, %v1007_v48  ;;  %2192 = vpow2.f32 %v994_v29  ;;  %v1025_v2 = vadd.f32 %v2175_v52, %v1024_v37 }
 0x190   : > { %2194 = vpow2.f32 %v964_v40 }
 0x191   : > { %v1009_v0 = vadd.f32 %v2165_v17, %v1008_v15  ;;  %v2177_v61 = vpop.eup %2176  ;;  %2196 = vpow2.f32 %v998_v31  ;;  %v927_v15 = vsub.f32 %v2957_v21, %v3083_v42  ;;  %v931_v31 = vsub.f32 %v2993_v14, %v3083_v42 }
 0x192   : > { %v2179_v54 = vpop.eup %2178  ;;  %2198 = vpow2.f32 %v968_v46 }
 0x193   : > { %v1010_v13 = vadd.f32 %v2167_v26, %v1009_v0  ;;  %v2181_v9 = vpop.eup %2180  ;;  %v1026_v53 = vadd.f32 %v2179_v54, %v1025_v2  ;;  %2200 = vpow2.f32 %v972_v6  ;;  %v929_v26 = vsub.f32 %v2978_v3, %v3083_v42 }
 0x194   : > { %v2183_v63 = vpop.eup %2182  ;;  %2202 = vpow2.f32 %v976_v33  ;;  %v988_v21 = vmul.f32 1.442695, %v927_v15  ;;  %v996_v6 = vmul.f32 1.442695, %v931_v31 }
 0x195   : > { %v1011_v4 = vadd.f32 %v2173_v12, %v1010_v13  ;;  %v2185_v11 = vpop.eup %2184  ;;  %v1027_v36 = vadd.f32 %v2183_v63, %v1026_v53  ;;  %2204 = vpow2.f32 %v980_v30  ;;  %v933_v12 = vsub.f32 %v3007_v44, %v3083_v42 }
 0x196   : > { %v2187_v17 = vpop.eup %2186  ;;  %2206 = vpow2.f32 %v984_v25  ;;  %v992_v3 = vmul.f32 1.442695, %v929_v26  ;;  %v1170_v63 = vrot.slane %v3011_v24, 4 }
 0x197   : > { %v1012_v48 = vadd.f32 %v2177_v61, %v1011_v4  ;;  %v2189_v0 = vpop.eup %2188  ;;  %v1028_v41 = vadd.f32 %v2187_v17, %v1027_v36  ;;  %2208 = vpow2.f32 %v988_v21  ;;  %v1000_v54 = vmul.f32 1.442695, %v933_v12 }
 0x198   : > { %v2191_v40 = vpop.eup %2190  ;;  %2210 = vpow2.f32 %v992_v3 }
 0x199   : > { %v1013_v19 = vadd.f32 %v2181_v9, %v1012_v48  ;;  %v2193_v8 = vpop.eup %2192  ;;  %v1029_v13 = vadd.f32 %v2191_v40, %v1028_v41  ;;  %2212 = vpow2.f32 %v996_v6 }
 0x19a   : > { %v2195_v28 = vpop.eup %2194  ;;  %2214 = vpow2.f32 %v1000_v54 }
 0x19b   : > { %v1014_v29 = vadd.f32 %v2185_v11, %v1013_v19  ;;  %v2197_v37 = vpop.eup %2196  ;;  %v1030_v52 = vadd.f32 %v2195_v28, %v1029_v13 }
 0x19c   : > { %v2199_v4 = vpop.eup %2198 }
 0x19d   : > { %v1015_v49 = vadd.f32 %v2189_v0, %v1014_v29  ;;  %v1031_v61 = vadd.f32 %v2199_v4, %v1030_v52  ;;  %v2201_v2 = vpop.eup %2200  ;;  %v1171_v29 = vadd.f32 %v1170_v63, %v3011_v24  ;;  %v1192_v52 = vrot.slane %v3019_v10, 4 }
 0x19e   : > { %v2203_v18 = vpop.eup %2202 }
 0x19f   : > { %v1016_v46 = vadd.f32 %v2193_v8, %v1015_v49  ;;  %v1032_v48 = vadd.f32 %v2201_v2, %v1031_v61  ;;  %v2205_v53 = vpop.eup %2204  ;;  %v1172_v49 = vrot.slane %v1171_v29, 2  ;;  %v1193_v2 = vadd.f32 %v1192_v52, %v3019_v10 }
 0x1a0   : > { %v2207_v15 = vpop.eup %2206 }
 0x1a1   : > { %v1017_v7 = vadd.f32 %v2197_v37, %v1016_v46  ;;  %v1033_v9 = vadd.f32 %v2203_v18, %v1032_v48  ;;  %v2209_v36 = vpop.eup %2208  ;;  %v1173_v13 = vadd.f32 %v1172_v49, %v1171_v29  ;;  %v1194_v48 = vrot.slane %v1193_v2, 2 }
 0x1a2   : > { %v2211_v25 = vpop.eup %2210  ;;  %v4183_v29 = vmov 0 }
 0x1a3   : > { %v1018_v14 = vrot.slane %v1017_v7, 4  ;;  %v1034_v19 = vadd.f32 %v2205_v53, %v1033_v9  ;;  %v2213_v40 = vpop.eup %2212  ;;  %v1174_v12 = vrot.slane %v1173_v13, 1  ;;  %v1195_v18 = vadd.f32 %v1194_v48, %v1193_v2 }
 0x1a4   : > { %v2215_v21 = vpop.eup %2214 }
 0x1a5   : > { %v1019_v33 = vadd.f32 %v1018_v14, %v1017_v7  ;;  %v1035_v11 = vadd.f32 %v2207_v15, %v1034_v19  ;;  %v1175_v6 = vadd.f32 %v1174_v12, %v1173_v13  ;;  %v1196_v53 = vrot.slane %v1195_v18, 1 }
 0x1a7   : > { %v1020_v44 = vrot.slane %v1019_v33, 2  ;;  %v1036_v26 = vadd.f32 %v2209_v36, %v1035_v11 }
 0x1a9   : > { %v1021_v30 = vadd.f32 %v1020_v44, %v1019_v33  ;;  %v1037_v41 = vadd.f32 %v2211_v25, %v1036_v26  ;;  %v2436_v33 = vmov 1966171168  }
 0x1aa   : > { %v1204_v9 = vunpack.c.l.s4 %v2436_v33 }
 0x1ab   : > { %v1022_v17 = vrot.slane %v1021_v30, 1  ;;  %v1038_v31 = vadd.f32 %v2213_v40, %v1037_v41 }
 0x1ac   : > { %v1205_v19 = vunpack.c.0.s8 %v1204_v9 }
 0x1ad   : > { %v1023_v0 = vadd.f32 %v1022_v17, %v1021_v30  ;;  %v1039_v8 = vadd.f32 %v2215_v21, %v1038_v31  ;;  %v1197_v30 = vadd.f32 %v1196_v53, %v1195_v18  ;;  %v4182_v17 = vlaneseq }
 0x1ae   : > { %v3156_v11 = vsub.s32 %v1205_v19, %v2674_v50 }
 0x1af   : > { %2216 = vlog2.f32 %v1023_v0  ;;  %v1040_v28 = vrot.slane %v1039_v8, 4  ;;  %vm3161_vm14 = vcmp.lt.s32.totalorder %v4182_v17, 256 }
 0x1b0   : > { %4181 = vst [vmem:[#allocation73_spill] sm:$0xff] %v3156_v11  ;;  %v4184_v29 = vsel %vm3161_vm14, 4294967295, %v4183_v29 }
 0x1b1   : > { %v1041_v46 = vadd.f32 %v1040_v28, %v1039_v8  ;;  %4185 = vst [vmem:[#allocation74_spill] sm:$0xff] %v4184_v29 }
 0x1b3   : > { %v1042_v3 = vrot.slane %v1041_v46, 2 }
 0x1b5   : > { %v1043_v24 = vadd.f32 %v1042_v3, %v1041_v46 }
 0x1b7   : > { %v1044_v61 = vrot.slane %v1043_v24, 1 }
 0x1b9   : > { %v2217_v37 = vpop.eup %2216  ;;  %v1045_v54 = vadd.f32 %v1044_v61, %v1043_v24 }
 0x1ba   : > { %v1047_v4 = vmul.f32 0.6931472, %v2217_v37 }
 0x1bb   : > { %2218 = vlog2.f32 %v1045_v54 }
 0x1bc   : > { %v1050_v7 = vadd.f32 %v1047_v4, %v3041_v57 }
 0x1be   : > { %v1198_v14 = vsub.f32 %v1050_v7, %v1175_v6 }
 0x1c5   : > { %v2219_v44 = vpop.eup %2218 }
 0x1c6   : > { %v1049_v63 = vmul.f32 0.6931472, %v2219_v44 }
 0x1c8   : > { %v1051_v15 = vadd.f32 %v1049_v63, %v3083_v42 }
 0x1ca   : > { %v1199_v57 = vsub.f32 %v1051_v15, %v1197_v30 }
 0x1cc   : > { %v1202_v10 = vcombine.low %v1198_v14, %v1199_v57  ;;  %1228 = sbr.rel (%p2044_p5) target bundleno = 584 (0x248), region = 74 }
 0x1ce   : > { %v1209_v36 = vrot.slane %v1202_v10, %v3156_v11 }
 0x1d0   : > { %v1216_v26 = vrot.slane %v1209_v36, %v3156_v11 }
 0x1d2   : > { %1222 = vst.msk [vmem:[%s3166_s26] sm:$0x3] %vm3161_vm14, %v1216_v26 }
 0x1d3   : > { %v1229_v42 = vmax.f32 %v3015_v32, %v3033_v23  ;;  %v1230_v25 = vmax.f32 %v3025_v45, %v3043_v35  ;;  %v1250_v0 = vmax.f32 %v3021_v43, %v3037_v56  ;;  %v1251_v41 = vmax.f32 %v3029_v27, %v3051_v38  ;;  %v4186_v24 = vld [vmem:[#allocation19_spill] sm:$0xff]  ;;  %v4187_v6 = vld [vmem:[#allocation17_spill] sm:$0xff]  ;;  %v4188_v2 = vld [vmem:[#allocation20_spill] sm:$0xff] }
 0x1d4   : > { %v4189_v54 = vld [vmem:[#allocation22_spill] sm:$0xff]  ;;  %v4190_v18 = vld [vmem:[#allocation25_spill] sm:$0xff]  ;;  %v4191_v9 = vld [vmem:[#allocation23_spill] sm:$0xff] }
 0x1d5   : > { %v1231_v40 = vmax.f32 %v1229_v42, %v3057_v51  ;;  %v1232_v49 = vmax.f32 %v1230_v25, %v3073_v20  ;;  %v1252_v31 = vmax.f32 %v1250_v0, %v3061_v39  ;;  %v1253_v21 = vmax.f32 %v1251_v41, %v3077_v34  ;;  %v4192_v44 = vld [vmem:[#allocation26_spill] sm:$0xff]  ;;  %v4193_v19 = vld [vmem:[#allocation9_spill] sm:$0xff]  ;;  %v4194_v30 = vld [vmem:[#allocation28_spill] sm:$0xff] }
 0x1d6   : > { %v2045_v15 = vadd.s32 4294967168, %v4193_v19  ;;  %v4195_v10 = vld [vmem:[#allocation31_spill] sm:$0xff]  ;;  %v4196_v17 = vld [vmem:[#allocation29_spill] sm:$0xff]  ;;  %v4197_v42 = vld [vmem:[#allocation32_spill] sm:$0xff] }
 0x1d7   : > { %v1233_v8 = vmax.f32 %v1231_v40, %v3085_v47  ;;  %v1234_v13 = vmax.f32 %v1232_v49, %v3101_v22  ;;  %v1254_v28 = vmax.f32 %v1252_v31, %v3087_v16  ;;  %v1255_v46 = vmax.f32 %v1253_v21, %v3107_v59  ;;  %v4198_v40 = vld [vmem:[#allocation13_spill] sm:$0xff]  ;;  %v4200_v31 = vld [vmem:[#allocation14_spill] sm:$0xff] }
 0x1d8   : > { %v3206_v49 = vrot.slane %v2045_v15, %v4198_v40  ;;  %v3209_v21 = vrot.slane %v2045_v15, %v4200_v31  ;;  %v4208_v15 = vld [vmem:[#allocation33_spill] sm:$0xff] }
 0x1d9   : > { %v1235_v12 = vmax.f32 %v1233_v8, %v3111_v58  ;;  %v1236_v3 = vmax.f32 %v1234_v13, %v2706_v60  ;;  %v1256_v37 = vmax.f32 %v1254_v28, %v3115_v5  ;;  %v1257_v52 = vmax.f32 %v1255_v46, %v2714_v62 }
 0x1da   : > { %4199 = vst [vmem:[#allocation75_spill] sm:$0xff] %v3206_v49  ;;  %vm1424_vm15 = vcmp.eq.s32.totalorder %v2674_v50, %v3206_v49  ;;  %vm1425_vm0 = vcmp.eq.s32.totalorder %v2674_v50, %v3209_v21 }
 0x1db   : > { %v1237_v4 = vmax.f32 %v1235_v12, %v2721_v1  ;;  %v1238_v7 = vmax.f32 %v1236_v3, %v4186_v24  ;;  %v1258_v61 = vmax.f32 %v1256_v37, %v4187_v6  ;;  %v1259_v14 = vmax.f32 %v1257_v52, %v4188_v2  ;;  %v4201_v12 = vld [vmem:[#allocation15_spill] sm:$0xff]  ;;  %v4202_v52 = vld [vmem:[#allocation16_spill] sm:$0xff] }
 0x1dc   : > { %vm1426_vm1 = vcmp.eq.s32.totalorder %v4201_v12, %v3206_v49  ;;  %vm1427_vm2 = vcmp.eq.s32.totalorder %v4201_v12, %v3209_v21  ;;  %vm1428_vm3 = vcmp.eq.s32.totalorder %v4202_v52, %v3206_v49  ;;  %vm1429_vm5 = vcmp.eq.s32.totalorder %v4202_v52, %v3209_v21 }
 0x1dd   : > { %v1239_v48 = vmax.f32 %v1237_v4, %v4189_v54  ;;  %v1240_v33 = vmax.f32 %v1238_v7, %v4190_v18  ;;  %v1260_v53 = vmax.f32 %v1258_v61, %v4191_v9  ;;  %v1261_v63 = vmax.f32 %v1259_v14, %v4192_v44  ;;  %v4203_v4 = vld [vmem:[#allocation18_spill] sm:$0xff]  ;;  %v4204_v7 = vld [vmem:[#allocation21_spill] sm:$0xff] }
 0x1de   : > { %v3277_v40 = vsel %vm1426_vm1, %v3025_v45, 0.0  ;;  %v3283_v31 = vsel %vm1427_vm2, %v3029_v27, 0.0  ;;  %vm4215_vm1 = vcmp.eq.s32.totalorder %v4204_v7, %v3206_v49  ;;  %vm4216_vm2 = vcmp.eq.s32.totalorder %v4204_v7, %v3209_v21 }
 0x1df   : > { %v1241_v57 = vmax.f32 %v1239_v48, %v4194_v30  ;;  %v1242_v36 = vmax.f32 %v1240_v33, %v4195_v10  ;;  %v1262_v26 = vmax.f32 %v1260_v53, %v4196_v17  ;;  %v1263_v25 = vmax.f32 %v1261_v63, %v4197_v42  ;;  %v4205_v48 = vld [vmem:[#allocation24_spill] sm:$0xff]  ;;  %v4206_v33 = vld [vmem:[#allocation27_spill] sm:$0xff]  ;;  %v4207_v53 = vld [vmem:[#allocation30_spill] sm:$0xff] }
 0x1e0   : > { %v3323_v52 = vsel %vm4216_vm2, %v3061_v39, 0.0  ;;  %vm4222_vm2 = vcmp.eq.s32.totalorder %v4207_v53, %v3209_v21 }
 0x1e1   : > { %v1243_v0 = vmax.f32 %v1241_v57, %v1242_v36  ;;  %v1264_v41 = vmax.f32 %v1262_v26, %v1263_v25  ;;  %v4209_v57 = vld [vmem:[#allocation36_spill] sm:$0xff]  ;;  %v4210_v36 = vld [vmem:[#allocation39_spill] sm:$0xff]  ;;  %v4211_v26 = vld [vmem:[#allocation42_spill] sm:$0xff] }
 0x1e2   : > { %vm1442_vm13 = vcmp.eq.s32.totalorder %v4209_v57, %v3206_v49  ;;  %vm1443_vm8 = vcmp.eq.s32.totalorder %v4209_v57, %v3209_v21  ;;  %vm1444_vm9 = vcmp.eq.s32.totalorder %v4210_v36, %v3206_v49  ;;  %vm1445_vm6 = vcmp.eq.s32.totalorder %v4210_v36, %v3209_v21  ;;  %v4212_v25 = vld [vmem:[#allocation45_spill] sm:$0xff] }
 0x1e3   : > { %v1244_v8 = vrot.slane %v1243_v0, 4  ;;  %v1265_v13 = vrot.slane %v1264_v41, 4  ;;  %vm1446_vm10 = vcmp.eq.s32.totalorder %v4211_v26, %v3206_v49  ;;  %vm1447_vm11 = vcmp.eq.s32.totalorder %v4211_v26, %v3209_v21 }
 0x1e4   : > { %vm1448_vm12 = vcmp.eq.s32.totalorder %v4212_v25, %v3206_v49  ;;  %v3383_v29 = vsel %vm1442_vm13, %v2706_v60, 0.0  ;;  %v3411_v57 = vsel %vm1446_vm10, %v4186_v24, 0.0  ;;  %v3417_v11 = vsel %vm1447_vm11, %v4188_v2, 0.0 }
 0x1e5   : > { %v1245_v28 = vmax.f32 %v1243_v0, %v1244_v8  ;;  %v1266_v46 = vmax.f32 %v1264_v41, %v1265_v13  ;;  %v3265_v0 = vsel %vm1424_vm15, %v3015_v32, 0.0  ;;  %v3271_v41 = vsel %vm1425_vm0, %v3021_v43, 0.0  ;;  %4225 = vst [vmem:[#allocation76_spill] sm:$0xff] %v3383_v29  ;;  %4229 = vst [vmem:[#allocation80_spill] sm:$0xff] %v3411_v57 }
 0x1e6   : > { %vm4213_vm15 = vcmp.eq.s32.totalorder %v4203_v4, %v3206_v49  ;;  %vm4214_vm0 = vcmp.eq.s32.totalorder %v4203_v4, %v3209_v21  ;;  %4230 = vst [vmem:[#allocation81_spill] sm:$0xff] %v3417_v11  ;;  %v3423_v36 = vsel %vm1448_vm12, %v4189_v54, 0.0 }
 0x1e7   : > { %v1246_v3 = vrot.slane %v1245_v28, 2  ;;  %v1267_v37 = vrot.slane %v1266_v46, 2  ;;  %v3305_v12 = vsel %vm4213_vm15, %v3043_v35, 0.0  ;;  %vm4219_vm15 = vcmp.eq.s32.totalorder %v4206_v33, %v3206_v49  ;;  %4231 = vst [vmem:[#allocation82_spill] sm:$0xff] %v3423_v36 }
 0x1e9   : > { %v1247_v61 = vmax.f32 %v1245_v28, %v1246_v3  ;;  %v1268_v14 = vmax.f32 %v1266_v46, %v1267_v37  ;;  %v3293_v28 = vsel %vm1428_vm3, %v3033_v23, 0.0  ;;  %v3299_v46 = vsel %vm1429_vm5, %v3037_v56, 0.0 }
 0x1ea   : > { %v3311_v3 = vsel %vm4214_vm0, %v3051_v38, 0.0  ;;  %v3317_v37 = vsel %vm4215_vm1, %v3057_v51, 0.0  ;;  %vm4217_vm3 = vcmp.eq.s32.totalorder %v4205_v48, %v3206_v49  ;;  %vm4218_vm5 = vcmp.eq.s32.totalorder %v4205_v48, %v3209_v21 }
 0x1eb   : > { %v1248_v63 = vrot.slane %v1247_v61, 1  ;;  %v1269_v19 = vrot.slane %v1268_v14, 1  ;;  %v3335_v4 = vsel %vm4218_vm5, %v3077_v34, 0.0  ;;  %vm4220_vm0 = vcmp.eq.s32.totalorder %v4206_v33, %v3209_v21 }
 0x1ec   : > { %v3347_v7 = vsel %vm4220_vm0, %v3087_v16, 0.0  ;;  %vm4221_vm1 = vcmp.eq.s32.totalorder %v4207_v53, %v3206_v49  ;;  %v3359_v48 = vsel %vm4222_vm2, %v3107_v59, 0.0  ;;  %vm4224_vm5 = vcmp.eq.s32.totalorder %v4208_v15, %v3209_v21 }
 0x1ed   : > { %v3285_v8 = vmax.f32 %v1247_v61, %v1248_v63  ;;  %v3287_v13 = vmax.f32 %v1268_v14, %v1269_v19  ;;  %v3329_v61 = vsel %vm4217_vm3, %v3073_v20, 0.0  ;;  %v3341_v14 = vsel %vm4219_vm15, %v3085_v47, 0.0 }
 0x1ee   : > { %v3353_v63 = vsel %vm4221_vm1, %v3101_v22, 0.0  ;;  %vm4223_vm3 = vcmp.eq.s32.totalorder %v4208_v15, %v3206_v49  ;;  %v3371_v33 = vsel %vm4224_vm5, %v3115_v5, 0.0 }
 0x1ef   : > { %v3365_v19 = vsel %vm4223_vm3, %v3111_v58, 0.0  ;;  %v1271_v50 = vsub.f32 %v3015_v32, %v3285_v8  ;;  %v1272_v53 = vsub.f32 %v3021_v43, %v3287_v13  ;;  %v1273_v55 = vsub.f32 %v3025_v45, %v3285_v8 }
 0x1f0   : > { %v1274_v15 = vsub.f32 %v3029_v27, %v3287_v13  ;;  %v3391_v32 = vsel %vm1443_vm8, %v2714_v62, 0.0  ;;  %v3397_v43 = vsel %vm1444_vm9, %v2721_v1, 0.0  ;;  %v3403_v45 = vsel %vm1445_vm6, %v4187_v6, 0.0 }
 0x1f1   : > { %4226 = vst [vmem:[#allocation77_spill] sm:$0xff] %v3391_v32  ;;  %4227 = vst [vmem:[#allocation78_spill] sm:$0xff] %v3397_v43  ;;  %v1275_v27 = vsub.f32 %v3033_v23, %v3285_v8  ;;  %v1276_v23 = vsub.f32 %v3037_v56, %v3287_v13  ;;  %v1278_v57 = vsub.f32 %v3051_v38, %v3287_v13  ;;  %v1303_v43 = vmul.f32 1.442695, %v1271_v50 }
 0x1f2   : > { %4228 = vst [vmem:[#allocation79_spill] sm:$0xff] %v3403_v45  ;;  %v1277_v45 = vsub.f32 %v3043_v35, %v3285_v8  ;;  %v1279_v26 = vsub.f32 %v3057_v51, %v3285_v8  ;;  %v1280_v11 = vsub.f32 %v3061_v39, %v3287_v13  ;;  %v1305_v32 = vmul.f32 1.442695, %v1272_v53 }
 0x1f3   : > { %v1307_v49 = vmul.f32 1.442695, %v1273_v55  ;;  %v1281_v36 = vsub.f32 %v3073_v20, %v3285_v8  ;;  %v1282_v56 = vsub.f32 %v3077_v34, %v3287_v13  ;;  %v1283_v35 = vsub.f32 %v3085_v47, %v3285_v8 }
 0x1f4   : > { %v1309_v29 = vmul.f32 1.442695, %v1274_v15  ;;  %v1284_v38 = vsub.f32 %v3087_v16, %v3287_v13  ;;  %v1285_v51 = vsub.f32 %v3101_v22, %v3285_v8  ;;  %2220 = vpow2.f32 %v1303_v43 }
 0x1f5   : > { %v1311_v50 = vmul.f32 1.442695, %v1275_v27  ;;  %v1286_v39 = vsub.f32 %v3107_v59, %v3287_v13  ;;  %v1287_v20 = vsub.f32 %v3111_v58, %v3285_v8  ;;  %2222 = vpow2.f32 %v1305_v32 }
 0x1f6   : > { %v1313_v55 = vmul.f32 1.442695, %v1276_v23  ;;  %v1288_v34 = vsub.f32 %v3115_v5, %v3287_v13  ;;  %v1289_v47 = vsub.f32 %v2706_v60, %v3285_v8  ;;  %2224 = vpow2.f32 %v1307_v49 }
 0x1f7   : > { %v1315_v16 = vmul.f32 1.442695, %v1277_v45  ;;  %v1290_v22 = vsub.f32 %v2714_v62, %v3287_v13  ;;  %v1291_v53 = vsub.f32 %v2721_v1, %v3285_v8  ;;  %2226 = vpow2.f32 %v1309_v29 }
 0x1f8   : > { %v1317_v59 = vmul.f32 1.442695, %v1278_v57  ;;  %v1292_v58 = vsub.f32 %v4187_v6, %v3287_v13  ;;  %v1293_v15 = vsub.f32 %v4186_v24, %v3285_v8  ;;  %2228 = vpow2.f32 %v1311_v50 }
 0x1f9   : > { %v1319_v5 = vmul.f32 1.442695, %v1279_v26  ;;  %2230 = vpow2.f32 %v1313_v55  ;;  %v1321_v60 = vmul.f32 1.442695, %v1280_v11  ;;  %v1488_v49 = vadd.f32 %v3277_v40, %v3265_v0 }
 0x1fa   : > { %v1509_v62 = vadd.f32 %v3283_v31, %v3271_v41  ;;  %v1294_v1 = vsub.f32 %v4188_v2, %v3287_v13  ;;  %v1295_v29 = vsub.f32 %v4189_v54, %v3285_v8  ;;  %2232 = vpow2.f32 %v1315_v16 }
 0x1fb   : > { %v1323_v6 = vmul.f32 1.442695, %v1281_v36  ;;  %v1296_v32 = vsub.f32 %v4191_v9, %v3287_v13  ;;  %v1297_v11 = vsub.f32 %v4190_v18, %v3285_v8  ;;  %2234 = vpow2.f32 %v1317_v59 }
 0x1fc   : > { %v1325_v43 = vmul.f32 1.442695, %v1282_v56  ;;  %v1298_v0 = vsub.f32 %v4192_v44, %v3287_v13  ;;  %v1299_v41 = vsub.f32 %v4194_v30, %v3285_v8  ;;  %2236 = vpow2.f32 %v1319_v5 }
 0x1fd   : > { %v1327_v2 = vmul.f32 1.442695, %v1283_v35  ;;  %2238 = vpow2.f32 %v1321_v60  ;;  %v1329_v40 = vmul.f32 1.442695, %v1284_v38  ;;  %v1489_v31 = vadd.f32 %v1488_v49, %v3293_v28 }
 0x1fe   : > { %v1510_v45 = vadd.f32 %v1509_v62, %v3299_v46  ;;  %v2221_v27 = vpop.eup %2220  ;;  %v1300_v57 = vsub.f32 %v4196_v17, %v3287_v13  ;;  %v1301_v36 = vsub.f32 %v4195_v10, %v3285_v8  ;;  %2240 = vpow2.f32 %v1323_v6 }
 0x1ff   : > { %v1331_v23 = vmul.f32 1.442695, %v1285_v51  ;;  %v2223_v26 = vpop.eup %2222  ;;  %2242 = vpow2.f32 %v1325_v43  ;;  %v1333_v56 = vmul.f32 1.442695, %v1286_v39  ;;  %v1490_v35 = vadd.f32 %v1489_v31, %v3305_v12 }
 0x200   : > { %v1511_v38 = vadd.f32 %v1510_v45, %v3311_v3  ;;  %v2225_v50 = vpop.eup %2224  ;;  %v1302_v28 = vsub.f32 %v4197_v42, %v3287_v13  ;;  %2244 = vpow2.f32 %v1327_v2  ;;  %v1335_v46 = vmul.f32 1.442695, %v1287_v20 }
 0x201   : > { %v1337_v55 = vmul.f32 1.442695, %v1288_v34  ;;  %v2227_v16 = vpop.eup %2226  ;;  %2246 = vpow2.f32 %v1329_v40  ;;  %v1367_v59 = vadd.f32 %v2225_v50, %v2221_v27  ;;  %v1491_v5 = vadd.f32 %v1490_v35, %v3317_v37  ;;  %v4232_v50 = vld [vmem:[#allocation76_spill] sm:$0xff] }
 0x202   : > { %v1512_v51 = vadd.f32 %v1511_v38, %v3323_v52  ;;  %v2229_v60 = vpop.eup %2228  ;;  %2248 = vpow2.f32 %v1331_v23  ;;  %v1339_v39 = vmul.f32 1.442695, %v1289_v47  ;;  %v1341_v12 = vmul.f32 1.442695, %v1290_v22 }
 0x203   : > { %v1388_v49 = vadd.f32 %v2227_v16, %v2223_v26  ;;  %v2231_v3 = vpop.eup %2230  ;;  %2250 = vpow2.f32 %v1333_v56  ;;  %v1368_v62 = vadd.f32 %v2229_v60, %v1367_v59  ;;  %v1492_v6 = vadd.f32 %v1491_v5, %v3329_v61 }
 0x204   : > { %v1513_v20 = vadd.f32 %v1512_v51, %v3335_v4  ;;  %v2233_v34 = vpop.eup %2232  ;;  %2252 = vpow2.f32 %v1335_v46  ;;  %v1343_v43 = vmul.f32 1.442695, %v1291_v53  ;;  %v1345_v2 = vmul.f32 1.442695, %v1292_v58  ;;  %v4234_v51 = vld [vmem:[#allocation78_spill] sm:$0xff] }
 0x205   : > { %v1389_v40 = vadd.f32 %v2231_v3, %v1388_v49  ;;  %v2235_v37 = vpop.eup %2234  ;;  %2254 = vpow2.f32 %v1337_v55  ;;  %v1369_v52 = vadd.f32 %v2233_v34, %v1368_v62  ;;  %vm1449_vm6 = vcmp.eq.s32.totalorder %v4212_v25, %v3209_v21  ;;  %v4233_v55 = vld [vmem:[#allocation77_spill] sm:$0xff] }
 0x206   : > { %v1493_v47 = vadd.f32 %v1492_v6, %v3341_v14  ;;  %v1514_v22 = vadd.f32 %v1513_v20, %v3347_v7  ;;  %v2237_v31 = vpop.eup %2236  ;;  %2256 = vpow2.f32 %v1339_v39  ;;  %v1347_v61 = vmul.f32 1.442695, %v1293_v15  ;;  %v4235_v39 = vld [vmem:[#allocation79_spill] sm:$0xff]  ;;  %v4236_v20 = vld [vmem:[#allocation80_spill] sm:$0xff] }
 0x207   : > { %v1349_v4 = vmul.f32 1.442695, %v1294_v1  ;;  %v1390_v53 = vadd.f32 %v2235_v37, %v1389_v40  ;;  %v2239_v58 = vpop.eup %2238  ;;  %2258 = vpow2.f32 %v1341_v12  ;;  %v1370_v45 = vadd.f32 %v2237_v31, %v1369_v52  ;;  %v4238_v52 = vld [vmem:[#allocation75_spill] sm:$0xff] }
 0x208   : > { %v1494_v27 = vadd.f32 %v1493_v47, %v3353_v63  ;;  %v1515_v23 = vadd.f32 %v1514_v22, %v3359_v48  ;;  %v2241_v26 = vpop.eup %2240  ;;  %2260 = vpow2.f32 %v1343_v43  ;;  %v1351_v14 = vmul.f32 1.442695, %v1295_v29  ;;  %v4237_v43 = vld [vmem:[#allocation81_spill] sm:$0xff]  ;;  %v4239_v47 = vld [vmem:[#allocation48_spill] sm:$0xff] }
 0x209   : > { %v1353_v24 = vmul.f32 1.442695, %v1296_v32  ;;  %v1391_v7 = vadd.f32 %v2239_v58, %v1390_v53  ;;  %v2243_v15 = vpop.eup %2242  ;;  %2262 = vpow2.f32 %v1345_v2  ;;  %v1371_v1 = vadd.f32 %v2241_v26, %v1370_v45 }
 0x20a   : > { %v1495_v56 = vadd.f32 %v1494_v27, %v3365_v19  ;;  %v1516_v63 = vadd.f32 %v1515_v23, %v3371_v33  ;;  %v2245_v35 = vpop.eup %2244  ;;  %2264 = vpow2.f32 %v1347_v61  ;;  %v1355_v48 = vmul.f32 1.442695, %v1297_v11 }
 0x20b   : > { %v1357_v54 = vmul.f32 1.442695, %v1298_v0  ;;  %v1392_v29 = vadd.f32 %v2243_v15, %v1391_v7  ;;  %v2247_v32 = vpop.eup %2246  ;;  %2266 = vpow2.f32 %v1349_v4  ;;  %v1372_v38 = vadd.f32 %v2245_v35, %v1371_v1  ;;  %v4240_v4 = vld [vmem:[#allocation82_spill] sm:$0xff] }
 0x20c   : > { %v1496_v46 = vadd.f32 %v1495_v56, %v4232_v50  ;;  %v1517_v19 = vadd.f32 %v1516_v63, %v4233_v55  ;;  %v2249_v16 = vpop.eup %2248  ;;  %2268 = vpow2.f32 %v1351_v14  ;;  %v1359_v33 = vmul.f32 1.442695, %v1299_v41 }
 0x20d   : > { %v1361_v11 = vmul.f32 1.442695, %v1300_v57  ;;  %v1393_v59 = vadd.f32 %v2247_v32, %v1392_v29  ;;  %v2251_v0 = vpop.eup %2250  ;;  %2270 = vpow2.f32 %v1353_v24  ;;  %v1373_v5 = vadd.f32 %v2249_v16, %v1372_v38  ;;  %v4242_v32 = vld [vmem:[#allocation54_spill] sm:$0xff] }
 0x20e   : > { %v1497_v60 = vadd.f32 %v1496_v46, %v4234_v51  ;;  %v1518_v12 = vadd.f32 %v1517_v19, %v4235_v39  ;;  %v2253_v49 = vpop.eup %2252  ;;  %2272 = vpow2.f32 %v1355_v48  ;;  %v1363_v3 = vmul.f32 1.442695, %v1301_v36 }
 0x20f   : > { %v1365_v41 = vmul.f32 1.442695, %v1302_v28  ;;  %v1394_v62 = vadd.f32 %v2251_v0, %v1393_v59  ;;  %v2255_v57 = vpop.eup %2254  ;;  %2274 = vpow2.f32 %v1357_v54  ;;  %v1374_v6 = vadd.f32 %v2253_v49, %v1373_v5 }
 0x210   : > { %v1498_v34 = vadd.f32 %v1497_v60, %v4236_v20  ;;  %v1519_v2 = vadd.f32 %v1518_v12, %v4237_v43  ;;  %v2257_v40 = vpop.eup %2256  ;;  %2276 = vpow2.f32 %v1359_v33  ;;  %vm1450_vm8 = vcmp.eq.s32.totalorder %v4239_v47, %v4238_v52 }
 0x211   : > { %v1395_v37 = vadd.f32 %v2255_v57, %v1394_v62  ;;  %v1481_v36 = vsel %vm1449_vm6, %v4191_v9, 0.0  ;;  %v2259_v28 = vpop.eup %2258  ;;  %2278 = vpow2.f32 %v1361_v11  ;;  %v1375_v22 = vadd.f32 %v2257_v40, %v1374_v6  ;;  %v4241_v9 = vld [vmem:[#allocation51_spill] sm:$0xff] }
 0x212   : > { %vm1451_vm9 = vcmp.eq.s32.totalorder %v4239_v47, %v3209_v21  ;;  %v2261_v31 = vpop.eup %2260  ;;  %2280 = vpow2.f32 %v1363_v3  ;;  %v1499_v53 = vadd.f32 %v1498_v34, %v4240_v4  ;;  %v1482_v27 = vsel %vm1450_vm8, %v4190_v18, 0.0 }
 0x213   : > { %v1396_v61 = vadd.f32 %v2259_v28, %v1395_v37  ;;  %v2263_v58 = vpop.eup %2262  ;;  %2282 = vpow2.f32 %v1365_v41  ;;  %v1376_v45 = vadd.f32 %v2261_v31, %v1375_v22  ;;  %v1520_v23 = vadd.f32 %v1519_v2, %v1481_v36 }
 0x214   : > { %v2265_v26 = vpop.eup %2264  ;;  %vm1452_vm10 = vcmp.eq.s32.totalorder %v4241_v9, %v4238_v52  ;;  %v1483_v14 = vsel %vm1451_vm9, %v4192_v44, 0.0  ;;  %vm1453_vm11 = vcmp.eq.s32.totalorder %v4241_v9, %v3209_v21  ;;  %v1500_v56 = vadd.f32 %v1499_v53, %v1482_v27 }
 0x215   : > { %v1397_v25 = vadd.f32 %v2263_v58, %v1396_v61  ;;  %v2267_v24 = vpop.eup %2266  ;;  %v1377_v7 = vadd.f32 %v2265_v26, %v1376_v45  ;;  %v1484_v18 = vsel %vm1452_vm10, %v4194_v30, 0.0  ;;  %v1521_v48 = vadd.f32 %v1520_v23, %v1483_v14 }
 0x216   : > { %v2269_v15 = vpop.eup %2268  ;;  %vm1454_vm12 = vcmp.eq.s32.totalorder %v4242_v32, %v4238_v52  ;;  %v1485_v44 = vsel %vm1453_vm11, %v4196_v17, 0.0  ;;  %vm1455_vm13 = vcmp.eq.s32.totalorder %v4242_v32, %v3209_v21  ;;  %v1501_v19 = vadd.f32 %v1500_v56, %v1484_v18 }
 0x217   : > { %v1398_v1 = vadd.f32 %v2267_v24, %v1397_v25  ;;  %v2271_v63 = vpop.eup %2270  ;;  %v1378_v35 = vadd.f32 %v2269_v15, %v1377_v7  ;;  %v1486_v30 = vsel %vm1454_vm12, %v4195_v10, 0.0  ;;  %v1522_v11 = vadd.f32 %v1521_v48, %v1485_v44  ;;  %v4243_v7 = vld [vmem:[#allocation73_spill] sm:$0xff] }
 0x218   : > { %v2273_v54 = vpop.eup %2272  ;;  %v1487_v5 = vsel %vm1455_vm13, %v4197_v42, 0.0  ;;  %v1502_v39 = vadd.f32 %v1501_v19, %v1486_v30 }
 0x219   : > { %v1399_v29 = vadd.f32 %v2271_v63, %v1398_v1  ;;  %v2275_v38 = vpop.eup %2274  ;;  %v1379_v50 = vadd.f32 %v2273_v54, %v1378_v35  ;;  %v1523_v49 = vadd.f32 %v1522_v11, %v1487_v5  ;;  %v1530_v1 = vld [vmem:[%s3166_s26] sm:$0x3] }
 0x21a   : > { %v2277_v46 = vpop.eup %2276  ;;  %v1503_v62 = vrot.slane %v1502_v39, 4 }
 0x21b   : > { %v1400_v55 = vadd.f32 %v2275_v38, %v1399_v29  ;;  %v2279_v16 = vpop.eup %2278  ;;  %v1380_v33 = vadd.f32 %v2277_v46, %v1379_v50  ;;  %v1524_v6 = vrot.slane %v1523_v49, 4 }
 0x21c   : > { %v2281_v59 = vpop.eup %2280  ;;  %v1504_v43 = vadd.f32 %v1503_v62, %v1502_v39 }
 0x21d   : > { %v1401_v0 = vadd.f32 %v2279_v16, %v1400_v55  ;;  %v2283_v51 = vpop.eup %2282  ;;  %v1381_v60 = vadd.f32 %v2281_v59, %v1380_v33  ;;  %v1525_v40 = vadd.f32 %v1524_v6, %v1523_v49 }
 0x21e   : > { %v1505_v47 = vrot.slane %v1504_v43, 2 }
 0x21f   : > { %v1402_v17 = vadd.f32 %v2283_v51, %v1401_v0  ;;  %v1382_v12 = vrot.slane %v1381_v60, 4  ;;  %v1526_v36 = vrot.slane %v1525_v40, 2 }
 0x220   : > { %v1506_v28 = vadd.f32 %v1505_v47, %v1504_v43 }
 0x221   : > { %v1403_v3 = vrot.slane %v1402_v17, 4  ;;  %v1383_v21 = vadd.f32 %v1382_v12, %v1381_v60  ;;  %v1527_v22 = vadd.f32 %v1526_v36, %v1525_v40 }
 0x222   : > { %v1507_v31 = vrot.slane %v1506_v28, 1 }
 0x223   : > { %v1404_v41 = vadd.f32 %v1403_v3, %v1402_v17  ;;  %v1384_v57 = vrot.slane %v1383_v21, 2  ;;  %v1528_v61 = vrot.slane %v1527_v22, 1 }
 0x224   : > { %v1508_v45 = vadd.f32 %v1507_v31, %v1506_v28 }
 0x225   : > { %v1405_v20 = vrot.slane %v1404_v41, 2  ;;  %v1385_v34 = vadd.f32 %v1384_v57, %v1383_v21  ;;  %v1529_v23 = vadd.f32 %v1528_v61, %v1527_v22 }
 0x227   : > { %v1406_v10 = vadd.f32 %v1405_v20, %v1404_v41  ;;  %v1386_v2 = vrot.slane %v1385_v34, 1 }
 0x229   : > { %v1407_v37 = vrot.slane %v1406_v10, 1  ;;  %v1387_v42 = vadd.f32 %v1386_v2, %v1385_v34 }
 0x22b   : > { %v1408_v52 = vadd.f32 %v1407_v37, %v1406_v10  ;;  %2284 = vlog2.f32 %v1387_v42 }
 0x22d   : > { %2286 = vlog2.f32 %v1408_v52 }
 0x235   : > { %v2285_v4 = vpop.eup %2284 }
 0x236   : > { %v1410_v58 = vmul.f32 0.6931472, %v2285_v4 }
 0x237   : > { %v2287_v53 = vpop.eup %2286 }
 0x238   : > { %v1412_v27 = vmul.f32 0.6931472, %v2287_v53  ;;  %v1413_v26 = vadd.f32 %v1410_v58, %v3285_v8 }
 0x23a   : > { %v1414_v25 = vadd.f32 %v1412_v27, %v3287_v13  ;;  %v1531_v9 = vsub.f32 %v1413_v26, %v1508_v45 }
 0x23c   : > { %v1532_v14 = vsub.f32 %v1414_v25, %v1529_v23 }
 0x23e   : > { %v1535_v24 = vcombine.low %v1531_v9, %v1532_v14 }
 0x240   : > { %v1542_v15 = vrot.slane %v1535_v24, %v4243_v7 }
 0x242   : > { %v1549_v56 = vrot.slane %v1542_v15, %v4243_v7 }
 0x244   : > { %v1551_v35 = vsel %vm2667_vm4, %v1549_v56, 0.0 }
 0x245   : > { %v1552_v18 = vadd.f32 %v1551_v35, %v1530_v1 }
 0x247   : > { %1553 = vst.msk [vmem:[%s3166_s26] sm:$0x3] %vm3161_vm14, %v1552_v18 }
 0x248 PF: > { %s1554_s27 = sadd.s32 1, %s2653_s14 }
 0x249   : > { %s1555_s5 = sld [smem:[#allocation3 + %s1554_s27]] }
 0x24f   : > { %p2046_p6 = scmp.le.s32.totalorder %s1555_s5, 0 }
 0x251   : > { %1559 = sbr.rel (%p2046_p6) target bundleno = 719 (0x2cf), region = 78 }
 0x258   : > { %v4246_v8 = vld [vmem:[#allocation40_spill] sm:$0xff]  ;;  %v4247_v13 = vld [vmem:[#allocation34_spill] sm:$0xff]  ;;  %v4248_v29 = vld [vmem:[#allocation43_spill] sm:$0xff] }
 0x259   : > { %v1560_v54 = vmax.f32 %v4247_v13, %v4246_v8  ;;  %v4249_v32 = vld [vmem:[#allocation37_spill] sm:$0xff]  ;;  %v4251_v50 = vld [vmem:[#allocation35_spill] sm:$0xff]  ;;  %v4252_v55 = vld [vmem:[#allocation44_spill] sm:$0xff] }
 0x25a   : > { %v1561_v44 = vmax.f32 %v4249_v32, %v4248_v29  ;;  %v4250_v38 = vld [vmem:[#allocation41_spill] sm:$0xff]  ;;  %v4253_v19 = vld [vmem:[#allocation38_spill] sm:$0xff]  ;;  %v4256_v0 = vld [vmem:[#allocation47_spill] sm:$0xff] }
 0x25b   : > { %v1581_v46 = vmax.f32 %v4251_v50, %v4250_v38  ;;  %v1582_v16 = vmax.f32 %v4253_v19, %v4252_v55  ;;  %v4254_v33 = vld [vmem:[#allocation46_spill] sm:$0xff]  ;;  %v4255_v11 = vld [vmem:[#allocation49_spill] sm:$0xff]  ;;  %v4258_v17 = vld [vmem:[#allocation52_spill] sm:$0xff] }
 0x25c   : > { %v1562_v30 = vmax.f32 %v1560_v54, %v4254_v33  ;;  %v1563_v59 = vmax.f32 %v1561_v44, %v4255_v11  ;;  %v4257_v51 = vld [vmem:[#allocation50_spill] sm:$0xff]  ;;  %v4259_v12 = vld [vmem:[#allocation55_spill] sm:$0xff]  ;;  %v4260_v3 = vld [vmem:[#allocation53_spill] sm:$0xff] }
 0x25d   : > { %v1583_v5 = vmax.f32 %v1581_v46, %v4256_v0  ;;  %v1584_v60 = vmax.f32 %v1582_v16, %v4257_v51  ;;  %v4261_v41 = vld [vmem:[#allocation56_spill] sm:$0xff]  ;;  %v4262_v57 = vld [vmem:[#allocation57_spill] sm:$0xff]  ;;  %v4263_v20 = vld [vmem:[#allocation59_spill] sm:$0xff] }
 0x25e   : > { %v1564_v39 = vmax.f32 %v1562_v30, %v4258_v17  ;;  %v1565_v49 = vmax.f32 %v1563_v59, %v4259_v12  ;;  %v4264_v10 = vld [vmem:[#allocation58_spill] sm:$0xff]  ;;  %v4265_v2 = vld [vmem:[#allocation60_spill] sm:$0xff]  ;;  %v4266_v37 = vld [vmem:[#allocation61_spill] sm:$0xff] }
 0x25f   : > { %v1585_v21 = vmax.f32 %v1583_v5, %v4260_v3  ;;  %v1586_v62 = vmax.f32 %v1584_v60, %v4261_v41  ;;  %v4267_v52 = vld [vmem:[#allocation63_spill] sm:$0xff]  ;;  %v4268_v36 = vld [vmem:[#allocation62_spill] sm:$0xff]  ;;  %v4269_v22 = vld [vmem:[#allocation64_spill] sm:$0xff] }
 0x260   : > { %v1566_v6 = vmax.f32 %v1564_v39, %v4262_v57  ;;  %v1567_v34 = vmax.f32 %v1565_v49, %v4263_v20  ;;  %v4270_v61 = vld [vmem:[#allocation65_spill] sm:$0xff]  ;;  %v4271_v53 = vld [vmem:[#allocation67_spill] sm:$0xff]  ;;  %v4272_v45 = vld [vmem:[#allocation66_spill] sm:$0xff] }
 0x261   : > { %v1587_v43 = vmax.f32 %v1585_v21, %v4264_v10  ;;  %v1588_v40 = vmax.f32 %v1586_v62, %v4265_v2  ;;  %v4273_v23 = vld [vmem:[#allocation68_spill] sm:$0xff]  ;;  %v4274_v25 = vld [vmem:[#allocation9_spill] sm:$0xff]  ;;  %v4276_v7 = vld [vmem:[#allocation71_spill] sm:$0xff] }
 0x262   : > { %v1568_v42 = vmax.f32 %v1566_v6, %v4266_v37  ;;  %v1569_v47 = vmax.f32 %v1567_v34, %v4267_v52  ;;  %v2047_v9 = vadd.s32 4294967040, %v4274_v25  ;;  %v4275_v14 = vld [vmem:[#allocation69_spill] sm:$0xff]  ;;  %v4277_v1 = vld [vmem:[#allocation70_spill] sm:$0xff]  ;;  %v4278_v63 = vld [vmem:[#allocation72_spill] sm:$0xff] }
 0x263   : > { %v1589_v28 = vmax.f32 %v1587_v43, %v4268_v36  ;;  %v1590_v31 = vmax.f32 %v1588_v40, %v4269_v22  ;;  %v4279_v54 = vld [vmem:[#allocation13_spill] sm:$0xff]  ;;  %v4281_v46 = vld [vmem:[#allocation14_spill] sm:$0xff]  ;;  %v4282_v39 = vld [vmem:[#allocation11_spill] sm:$0xff] }
 0x264   : > { %v1570_v4 = vmax.f32 %v1568_v42, %v4270_v61  ;;  %v1571_v58 = vmax.f32 %v1569_v47, %v4271_v53  ;;  %v3600_v44 = vrot.slane %v2047_v9, %v4279_v54  ;;  %v3603_v16 = vrot.slane %v2047_v9, %v4281_v46  ;;  %v4283_v49 = vld [vmem:[#allocation15_spill] sm:$0xff]  ;;  %v4284_v6 = vld [vmem:[#allocation16_spill] sm:$0xff]  ;;  %v4285_v34 = vld [vmem:[#allocation18_spill] sm:$0xff] }
 0x265   : > { %v1591_v27 = vmax.f32 %v1589_v28, %v4272_v45  ;;  %v1592_v26 = vmax.f32 %v1590_v31, %v4273_v23  ;;  %v4286_v43 = vld [vmem:[#allocation21_spill] sm:$0xff]  ;;  %v4287_v47 = vld [vmem:[#allocation24_spill] sm:$0xff]  ;;  %v4288_v28 = vld [vmem:[#allocation27_spill] sm:$0xff] }
 0x266   : > { %v1572_v24 = vmax.f32 %v1570_v4, %v4275_v14  ;;  %v1573_v15 = vmax.f32 %v1571_v58, %v4276_v7  ;;  %4280 = vst [vmem:[#allocation83_spill] sm:$0xff] %v3600_v44  ;;  %vm1755_vm4 = vcmp.eq.s32.totalorder %v4282_v39, %v3600_v44  ;;  %vm1756_vm15 = vcmp.eq.s32.totalorder %v4282_v39, %v3603_v16  ;;  %v4289_v31 = vld [vmem:[#allocation30_spill] sm:$0xff]  ;;  %v4292_v25 = vld [vmem:[#allocation39_spill] sm:$0xff] }
 0x267   : > { %v1593_v56 = vmax.f32 %v1591_v27, %v4277_v1  ;;  %v1594_v35 = vmax.f32 %v1592_v26, %v4278_v63  ;;  %vm1757_vm0 = vcmp.eq.s32.totalorder %v4283_v49, %v3600_v44  ;;  %vm1758_vm1 = vcmp.eq.s32.totalorder %v4283_v49, %v3603_v16  ;;  %v4290_v27 = vld [vmem:[#allocation33_spill] sm:$0xff]  ;;  %v4291_v26 = vld [vmem:[#allocation36_spill] sm:$0xff]  ;;  %v4293_v9 = vld [vmem:[#allocation42_spill] sm:$0xff] }
 0x268   : > { %v1574_v18 = vmax.f32 %v1572_v24, %v1573_v15  ;;  %vm1759_vm2 = vcmp.eq.s32.totalorder %v4284_v6, %v3600_v44  ;;  %vm1760_vm3 = vcmp.eq.s32.totalorder %v4284_v6, %v3603_v16  ;;  %vm1761_vm5 = vcmp.eq.s32.totalorder %v4285_v34, %v3600_v44  ;;  %v4294_v24 = vld [vmem:[#allocation45_spill] sm:$0xff] }
 0x269   : > { %v1595_v48 = vmax.f32 %v1593_v56, %v1594_v35  ;;  %vm1773_vm12 = vcmp.eq.s32.totalorder %v4291_v26, %v3600_v44  ;;  %vm1774_vm13 = vcmp.eq.s32.totalorder %v4291_v26, %v3603_v16  ;;  %vm1775_vm8 = vcmp.eq.s32.totalorder %v4292_v25, %v3600_v44 }
 0x26a   : > { %v1575_v30 = vrot.slane %v1574_v18, 4  ;;  %vm1776_vm6 = vcmp.eq.s32.totalorder %v4292_v25, %v3603_v16  ;;  %vm1777_vm9 = vcmp.eq.s32.totalorder %v4293_v9, %v3600_v44  ;;  %vm1778_vm10 = vcmp.eq.s32.totalorder %v4293_v9, %v3603_v16 }
 0x26b   : > { %v1596_v59 = vrot.slane %v1595_v48, 4  ;;  %vm1779_vm11 = vcmp.eq.s32.totalorder %v4294_v24, %v3600_v44  ;;  %v3659_v15 = vsel %vm1755_vm4, %v4247_v13, 0.0  ;;  %v3665_v56 = vsel %vm1756_vm15, %v4251_v50, 0.0 }
 0x26c   : > { %v1576_v5 = vmax.f32 %v1574_v18, %v1575_v30  ;;  %v3671_v35 = vsel %vm1757_vm0, %v4249_v32, 0.0  ;;  %v3677_v18 = vsel %vm1758_vm1, %v4253_v19, 0.0  ;;  %v3687_v46 = vsel %vm1759_vm2, %v4246_v8, 0.0 }
 0x26d   : > { %v1597_v60 = vmax.f32 %v1595_v48, %v1596_v59  ;;  %v3693_v30 = vsel %vm1760_vm3, %v4250_v38, 0.0  ;;  %v3699_v59 = vsel %vm1761_vm5, %v4248_v29, 0.0  ;;  %vm4295_vm4 = vcmp.eq.s32.totalorder %v4285_v34, %v3603_v16 }
 0x26e   : > { %v1577_v21 = vrot.slane %v1576_v5, 2  ;;  %vm4296_vm15 = vcmp.eq.s32.totalorder %v4286_v43, %v3600_v44  ;;  %vm4297_vm0 = vcmp.eq.s32.totalorder %v4286_v43, %v3603_v16  ;;  %vm4298_vm1 = vcmp.eq.s32.totalorder %v4287_v47, %v3600_v44 }
 0x26f   : > { %v1598_v62 = vrot.slane %v1597_v60, 2  ;;  %v3717_v39 = vsel %vm4297_vm0, %v4256_v0, 0.0  ;;  %v3723_v49 = vsel %vm4298_vm1, %v4255_v11, 0.0  ;;  %vm4299_vm2 = vcmp.eq.s32.totalorder %v4287_v47, %v3603_v16 }
 0x270   : > { %v1578_v40 = vmax.f32 %v1576_v5, %v1577_v21  ;;  %v3705_v5 = vsel %vm4295_vm4, %v4252_v55, 0.0  ;;  %v3729_v21 = vsel %vm4299_vm2, %v4257_v51, 0.0  ;;  %vm4300_vm3 = vcmp.eq.s32.totalorder %v4288_v28, %v3600_v44 }
 0x271   : > { %v1599_v42 = vmax.f32 %v1597_v60, %v1598_v62  ;;  %v3711_v60 = vsel %vm4296_vm15, %v4254_v33, 0.0  ;;  %v3735_v62 = vsel %vm4300_vm3, %v4258_v17, 0.0  ;;  %vm4301_vm5 = vcmp.eq.s32.totalorder %v4288_v28, %v3603_v16 }
 0x272   : > { %v1579_v4 = vrot.slane %v1578_v40, 1  ;;  %v3741_v6 = vsel %vm4301_vm5, %v4260_v3, 0.0  ;;  %vm4302_vm4 = vcmp.eq.s32.totalorder %v4289_v31, %v3600_v44  ;;  %vm4303_vm15 = vcmp.eq.s32.totalorder %v4289_v31, %v3603_v16 }
 0x273   : > { %v1600_v58 = vrot.slane %v1599_v42, 1  ;;  %v3747_v34 = vsel %vm4302_vm4, %v4259_v12, 0.0  ;;  %v3753_v43 = vsel %vm4303_vm15, %v4261_v41, 0.0  ;;  %vm4304_vm0 = vcmp.eq.s32.totalorder %v4290_v27, %v3600_v44 }
 0x274   : > { %v3679_v48 = vmax.f32 %v1578_v40, %v1579_v4  ;;  %v3759_v40 = vsel %vm4304_vm0, %v4262_v57, 0.0  ;;  %vm4305_vm1 = vcmp.eq.s32.totalorder %v4290_v27, %v3603_v16  ;;  %v3777_v4 = vsel %vm1773_vm12, %v4263_v20, 0.0 }
 0x275   : > { %v3681_v54 = vmax.f32 %v1599_v42, %v1600_v58  ;;  %v3765_v42 = vsel %vm4305_vm1, %v4264_v10, 0.0  ;;  %4306 = vst [vmem:[#allocation84_spill] sm:$0xff] %v3777_v4  ;;  %v3805_v27 = vsel %vm1777_vm9, %v4267_v52, 0.0  ;;  %v3811_v26 = vsel %vm1778_vm10, %v4269_v22, 0.0 }
 0x276   : > { %v1602_v47 = vsub.f32 %v4247_v13, %v3679_v48  ;;  %v1604_v31 = vsub.f32 %v4249_v32, %v3679_v48  ;;  %v3785_v13 = vsel %vm1774_vm13, %v4265_v2, 0.0  ;;  %v3791_v32 = vsel %vm1775_vm8, %v4266_v37, 0.0  ;;  %4310 = vst [vmem:[#allocation88_spill] sm:$0xff] %v3805_v27  ;;  %4311 = vst [vmem:[#allocation89_spill] sm:$0xff] %v3811_v26 }
 0x277   : > { %v1603_v28 = vsub.f32 %v4251_v50, %v3681_v54  ;;  %v1605_v58 = vsub.f32 %v4253_v19, %v3681_v54  ;;  %4307 = vst [vmem:[#allocation85_spill] sm:$0xff] %v3785_v13  ;;  %4308 = vst [vmem:[#allocation86_spill] sm:$0xff] %v3791_v32  ;;  %v3797_v50 = vsel %vm1776_vm6, %v4268_v36, 0.0  ;;  %v1606_v19 = vsub.f32 %v4246_v8, %v3679_v48 }
 0x278   : > { %4309 = vst [vmem:[#allocation87_spill] sm:$0xff] %v3797_v50  ;;  %v3817_v25 = vsel %vm1779_vm11, %v4270_v61, 0.0  ;;  %v1607_v8 = vsub.f32 %v4250_v38, %v3681_v54  ;;  %v1608_v50 = vsub.f32 %v4248_v29, %v3679_v48  ;;  %v1609_v27 = vsub.f32 %v4252_v55, %v3681_v54 }
 0x279   : > { %4312 = vst [vmem:[#allocation90_spill] sm:$0xff] %v3817_v25  ;;  %v1610_v9 = vsub.f32 %v4254_v33, %v3679_v48  ;;  %v1611_v26 = vsub.f32 %v4256_v0, %v3681_v54  ;;  %v1634_v32 = vmul.f32 1.442695, %v1602_v47  ;;  %v1636_v13 = vmul.f32 1.442695, %v1603_v28 }
 0x27a   : > { %v1638_v44 = vmul.f32 1.442695, %v1604_v31  ;;  %v1612_v25 = vsub.f32 %v4255_v11, %v3679_v48  ;;  %v1613_v38 = vsub.f32 %v4257_v51, %v3681_v54  ;;  %v1614_v29 = vsub.f32 %v4258_v17, %v3679_v48 }
 0x27b   : > { %v1640_v4 = vmul.f32 1.442695, %v1605_v58  ;;  %v1615_v55 = vsub.f32 %v4260_v3, %v3681_v54  ;;  %v1616_v33 = vsub.f32 %v4259_v12, %v3679_v48  ;;  %2288 = vpow2.f32 %v1634_v32 }
 0x27c   : > { %v1642_v0 = vmul.f32 1.442695, %v1606_v19  ;;  %v1617_v47 = vsub.f32 %v4261_v41, %v3681_v54  ;;  %v1618_v11 = vsub.f32 %v4262_v57, %v3679_v48  ;;  %2290 = vpow2.f32 %v1636_v13 }
 0x27d   : > { %v1644_v51 = vmul.f32 1.442695, %v1607_v8  ;;  %v1619_v17 = vsub.f32 %v4264_v10, %v3681_v54  ;;  %v1620_v28 = vsub.f32 %v4263_v20, %v3679_v48  ;;  %2292 = vpow2.f32 %v1638_v44 }
 0x27e   : > { %v1646_v3 = vmul.f32 1.442695, %v1608_v50  ;;  %v1621_v12 = vsub.f32 %v4265_v2, %v3681_v54  ;;  %v1622_v31 = vsub.f32 %v4266_v37, %v3679_v48  ;;  %2294 = vpow2.f32 %v1640_v4 }
 0x27f   : > { %v1648_v41 = vmul.f32 1.442695, %v1609_v27  ;;  %v1623_v57 = vsub.f32 %v4268_v36, %v3681_v54  ;;  %v1624_v58 = vsub.f32 %v4267_v52, %v3679_v48  ;;  %2296 = vpow2.f32 %v1642_v0 }
 0x280   : > { %v1650_v10 = vmul.f32 1.442695, %v1610_v9  ;;  %2298 = vpow2.f32 %v1644_v51  ;;  %v1652_v20 = vmul.f32 1.442695, %v1611_v26  ;;  %v1819_v44 = vadd.f32 %v3671_v35, %v3659_v15 }
 0x281   : > { %v1840_v2 = vadd.f32 %v3677_v18, %v3665_v56  ;;  %v1625_v37 = vsub.f32 %v4269_v22, %v3681_v54  ;;  %v1626_v4 = vsub.f32 %v4270_v61, %v3679_v48  ;;  %2300 = vpow2.f32 %v1646_v3 }
 0x282   : > { %v1654_v36 = vmul.f32 1.442695, %v1612_v25  ;;  %v1627_v13 = vsub.f32 %v4272_v45, %v3681_v54  ;;  %v1628_v32 = vsub.f32 %v4271_v53, %v3679_v48  ;;  %2302 = vpow2.f32 %v1648_v41 }
 0x283   : > { %v1656_v50 = vmul.f32 1.442695, %v1613_v38  ;;  %v1629_v15 = vsub.f32 %v4273_v23, %v3681_v54  ;;  %v1630_v56 = vsub.f32 %v4275_v14, %v3679_v48  ;;  %2304 = vpow2.f32 %v1650_v10 }
 0x284   : > { %v1658_v22 = vmul.f32 1.442695, %v1614_v29  ;;  %2306 = vpow2.f32 %v1652_v20  ;;  %v1660_v35 = vmul.f32 1.442695, %v1615_v55  ;;  %v1820_v18 = vadd.f32 %v1819_v44, %v3687_v46 }
 0x285   : > { %v1841_v19 = vadd.f32 %v1840_v2, %v3693_v30  ;;  %v2289_v27 = vpop.eup %2288  ;;  %v1631_v26 = vsub.f32 %v4277_v1, %v3681_v54  ;;  %v1632_v25 = vsub.f32 %v4276_v7, %v3679_v48  ;;  %2308 = vpow2.f32 %v1654_v36 }
 0x286   : > { %v1662_v8 = vmul.f32 1.442695, %v1616_v33  ;;  %v2291_v9 = vpop.eup %2290  ;;  %2310 = vpow2.f32 %v1656_v50  ;;  %v1664_v38 = vmul.f32 1.442695, %v1617_v47  ;;  %v1821_v29 = vadd.f32 %v1820_v18, %v3699_v59 }
 0x287   : > { %v1842_v55 = vadd.f32 %v1841_v19, %v3705_v5  ;;  %v2293_v0 = vpop.eup %2292  ;;  %v1633_v46 = vsub.f32 %v4278_v63, %v3681_v54  ;;  %2312 = vpow2.f32 %v1658_v22  ;;  %v1666_v30 = vmul.f32 1.442695, %v1618_v11 }
 0x288   : > { %v1668_v51 = vmul.f32 1.442695, %v1619_v17  ;;  %v2295_v3 = vpop.eup %2294  ;;  %2314 = vpow2.f32 %v1660_v35  ;;  %v1698_v41 = vadd.f32 %v2293_v0, %v2289_v27  ;;  %v1822_v10 = vadd.f32 %v1821_v29, %v3711_v60  ;;  %v4313_v0 = vld [vmem:[#allocation84_spill] sm:$0xff] }
 0x289   : > { %v1843_v33 = vadd.f32 %v1842_v55, %v3717_v39  ;;  %v2297_v20 = vpop.eup %2296  ;;  %2316 = vpow2.f32 %v1662_v8  ;;  %v1670_v47 = vmul.f32 1.442695, %v1620_v28  ;;  %v1672_v59 = vmul.f32 1.442695, %v1621_v12 }
 0x28a   : > { %v1719_v44 = vadd.f32 %v2295_v3, %v2291_v9  ;;  %v2299_v5 = vpop.eup %2298  ;;  %2318 = vpow2.f32 %v1664_v38  ;;  %v1699_v2 = vadd.f32 %v2297_v20, %v1698_v41  ;;  %v1823_v36 = vadd.f32 %v1822_v10, %v3723_v49 }
 0x28b   : > { %v1844_v11 = vadd.f32 %v1843_v33, %v3729_v21  ;;  %v2301_v17 = vpop.eup %2300  ;;  %2320 = vpow2.f32 %v1666_v30  ;;  %v1674_v50 = vmul.f32 1.442695, %v1622_v31  ;;  %v1676_v22 = vmul.f32 1.442695, %v1623_v57  ;;  %v4315_v33 = vld [vmem:[#allocation86_spill] sm:$0xff] }
 0x28c   : > { %v1720_v35 = vadd.f32 %v2299_v5, %v1719_v44  ;;  %v2303_v60 = vpop.eup %2302  ;;  %2322 = vpow2.f32 %v1668_v51  ;;  %v1700_v39 = vadd.f32 %v2301_v17, %v1699_v2  ;;  %vm1780_vm6 = vcmp.eq.s32.totalorder %v4294_v24, %v3603_v16  ;;  %v4314_v51 = vld [vmem:[#allocation85_spill] sm:$0xff] }
 0x28d   : > { %v1824_v28 = vadd.f32 %v1823_v36, %v3735_v62  ;;  %v1845_v12 = vadd.f32 %v1844_v11, %v3741_v6  ;;  %v2305_v18 = vpop.eup %2304  ;;  %2324 = vpow2.f32 %v1670_v47  ;;  %v1678_v49 = vmul.f32 1.442695, %v1624_v58  ;;  %v4316_v47 = vld [vmem:[#allocation87_spill] sm:$0xff]  ;;  %v4317_v11 = vld [vmem:[#allocation88_spill] sm:$0xff] }
 0x28e   : > { %v1680_v21 = vmul.f32 1.442695, %v1625_v37  ;;  %v1721_v31 = vadd.f32 %v2303_v60, %v1720_v35  ;;  %v2307_v57 = vpop.eup %2306  ;;  %2326 = vpow2.f32 %v1672_v59  ;;  %v1701_v19 = vadd.f32 %v2305_v18, %v1700_v39  ;;  %v4319_v39 = vld [vmem:[#allocation83_spill] sm:$0xff] }
 0x28f   : > { %v1825_v27 = vadd.f32 %v1824_v28, %v3747_v34  ;;  %v1846_v8 = vadd.f32 %v1845_v12, %v3753_v43  ;;  %v2309_v9 = vpop.eup %2308  ;;  %2328 = vpow2.f32 %v1674_v50  ;;  %v1682_v62 = vmul.f32 1.442695, %v1626_v4  ;;  %v4318_v50 = vld [vmem:[#allocation89_spill] sm:$0xff]  ;;  %v4320_v28 = vld [vmem:[#allocation48_spill] sm:$0xff] }
 0x290   : > { %v1684_v52 = vmul.f32 1.442695, %v1627_v13  ;;  %v1722_v6 = vadd.f32 %v2307_v57, %v1721_v31  ;;  %v2311_v58 = vpop.eup %2310  ;;  %2330 = vpow2.f32 %v1676_v22  ;;  %v1702_v37 = vadd.f32 %v2309_v9, %v1701_v19 }
 0x291   : > { %v1826_v38 = vadd.f32 %v1825_v27, %v3759_v40  ;;  %v1847_v34 = vadd.f32 %v1846_v8, %v3765_v42  ;;  %v2313_v29 = vpop.eup %2312  ;;  %2332 = vpow2.f32 %v1678_v49  ;;  %v1686_v43 = vmul.f32 1.442695, %v1628_v32 }
 0x292   : > { %v1688_v61 = vmul.f32 1.442695, %v1629_v15  ;;  %v1723_v4 = vadd.f32 %v2311_v58, %v1722_v6  ;;  %v2315_v13 = vpop.eup %2314  ;;  %2334 = vpow2.f32 %v1680_v21  ;;  %v1703_v55 = vadd.f32 %v2313_v29, %v1702_v37  ;;  %v4321_v21 = vld [vmem:[#allocation90_spill] sm:$0xff] }
 0x293   : > { %v1827_v30 = vadd.f32 %v1826_v38, %v4313_v0  ;;  %v1848_v40 = vadd.f32 %v1847_v34, %v4314_v51  ;;  %v2317_v3 = vpop.eup %2316  ;;  %2336 = vpow2.f32 %v1682_v62  ;;  %v1690_v42 = vmul.f32 1.442695, %v1630_v56 }
 0x294   : > { %v1692_v32 = vmul.f32 1.442695, %v1631_v26  ;;  %v1724_v41 = vadd.f32 %v2315_v13, %v1723_v4  ;;  %v2319_v15 = vpop.eup %2318  ;;  %2338 = vpow2.f32 %v1684_v52  ;;  %v1704_v10 = vadd.f32 %v2317_v3, %v1703_v55  ;;  %v4323_v13 = vld [vmem:[#allocation54_spill] sm:$0xff] }
 0x295   : > { %v1828_v20 = vadd.f32 %v1827_v30, %v4315_v33  ;;  %v1849_v59 = vadd.f32 %v1848_v40, %v4316_v47  ;;  %v2321_v44 = vpop.eup %2320  ;;  %2340 = vpow2.f32 %v1686_v43  ;;  %v1694_v5 = vmul.f32 1.442695, %v1632_v25 }
 0x296   : > { %v1696_v56 = vmul.f32 1.442695, %v1633_v46  ;;  %v1725_v2 = vadd.f32 %v2319_v15, %v1724_v41  ;;  %v2323_v26 = vpop.eup %2322  ;;  %2342 = vpow2.f32 %v1688_v61  ;;  %v1705_v36 = vadd.f32 %v2321_v44, %v1704_v10 }
 0x297   : > { %v1829_v17 = vadd.f32 %v1828_v20, %v4317_v11  ;;  %v1850_v22 = vadd.f32 %v1849_v59, %v4318_v50  ;;  %v2325_v35 = vpop.eup %2324  ;;  %2344 = vpow2.f32 %v1690_v42  ;;  %vm1781_vm8 = vcmp.eq.s32.totalorder %v4320_v28, %v4319_v39 }
 0x298   : > { %v1726_v60 = vadd.f32 %v2323_v26, %v1725_v2  ;;  %v1812_v25 = vsel %vm1780_vm6, %v4272_v45, 0.0  ;;  %v2327_v46 = vpop.eup %2326  ;;  %2346 = vpow2.f32 %v1692_v32  ;;  %v1706_v12 = vadd.f32 %v2325_v35, %v1705_v36  ;;  %v4322_v45 = vld [vmem:[#allocation51_spill] sm:$0xff] }
 0x299   : > { %vm1782_vm9 = vcmp.eq.s32.totalorder %v4320_v28, %v3603_v16  ;;  %v2329_v18 = vpop.eup %2328  ;;  %2348 = vpow2.f32 %v1694_v5  ;;  %v1830_v31 = vadd.f32 %v1829_v17, %v4321_v21  ;;  %v1813_v27 = vsel %vm1781_vm8, %v4271_v53, 0.0 }
 0x29a   : > { %v1727_v49 = vadd.f32 %v2327_v46, %v1726_v60  ;;  %v2331_v57 = vpop.eup %2330  ;;  %2350 = vpow2.f32 %v1696_v56  ;;  %v1707_v19 = vadd.f32 %v2329_v18, %v1706_v12  ;;  %v1851_v8 = vadd.f32 %v1850_v22, %v1812_v25 }
 0x29b   : > { %v2333_v9 = vpop.eup %2332  ;;  %vm1783_vm10 = vcmp.eq.s32.totalorder %v4322_v45, %v4319_v39  ;;  %v1814_v62 = vsel %vm1782_vm9, %v4273_v23, 0.0  ;;  %vm1784_vm11 = vcmp.eq.s32.totalorder %v4322_v45, %v3603_v16  ;;  %v1831_v38 = vadd.f32 %v1830_v31, %v1813_v27 }
 0x29c   : > { %v1728_v24 = vadd.f32 %v2331_v57, %v1727_v49  ;;  %v2335_v52 = vpop.eup %2334  ;;  %v1708_v6 = vadd.f32 %v2333_v9, %v1707_v19  ;;  %v1815_v53 = vsel %vm1783_vm10, %v4275_v14, 0.0  ;;  %v1852_v43 = vadd.f32 %v1851_v8, %v1814_v62 }
 0x29d   : > { %v2337_v58 = vpop.eup %2336  ;;  %vm1785_vm12 = vcmp.eq.s32.totalorder %v4323_v13, %v4319_v39  ;;  %v1816_v23 = vsel %vm1784_vm11, %v4277_v1, 0.0  ;;  %vm1786_vm13 = vcmp.eq.s32.totalorder %v4323_v13, %v3603_v16  ;;  %v1832_v40 = vadd.f32 %v1831_v38, %v1815_v53 }
 0x29e   : > { %v1729_v37 = vadd.f32 %v2335_v52, %v1728_v24  ;;  %v2339_v34 = vpop.eup %2338  ;;  %v1709_v29 = vadd.f32 %v2337_v58, %v1708_v6  ;;  %v1817_v14 = vsel %vm1785_vm12, %v4276_v7, 0.0  ;;  %v1853_v32 = vadd.f32 %v1852_v43, %v1816_v23  ;;  %v4324_v6 = vld [vmem:[#allocation73_spill] sm:$0xff] }
 0x29f   : > { %v2341_v61 = vpop.eup %2340  ;;  %v1818_v10 = vsel %vm1786_vm13, %v4278_v63, 0.0  ;;  %v1833_v47 = vadd.f32 %v1832_v40, %v1817_v14 }
 0x2a0   : > { %v1730_v4 = vadd.f32 %v2339_v34, %v1729_v37  ;;  %v2343_v55 = vpop.eup %2342  ;;  %v1710_v0 = vadd.f32 %v2341_v61, %v1709_v29  ;;  %v1854_v44 = vadd.f32 %v1853_v32, %v1818_v10  ;;  %v1861_v37 = vld [vmem:[%s3166_s26] sm:$0x3] }
 0x2a1   : > { %v2345_v30 = vpop.eup %2344  ;;  %v1834_v2 = vrot.slane %v1833_v47, 4 }
 0x2a2   : > { %v1731_v51 = vadd.f32 %v2343_v55, %v1730_v4  ;;  %v2347_v3 = vpop.eup %2346  ;;  %v1711_v42 = vadd.f32 %v2345_v30, %v1710_v0  ;;  %v1855_v36 = vrot.slane %v1854_v44, 4 }
 0x2a3   : > { %v2349_v41 = vpop.eup %2348  ;;  %v1835_v50 = vadd.f32 %v1834_v2, %v1833_v47 }
 0x2a4   : > { %v1732_v15 = vadd.f32 %v2347_v3, %v1731_v51  ;;  %v2351_v33 = vpop.eup %2350  ;;  %v1712_v20 = vadd.f32 %v2349_v41, %v1711_v42  ;;  %v1856_v35 = vadd.f32 %v1855_v36, %v1854_v44 }
 0x2a5   : > { %v1836_v28 = vrot.slane %v1835_v50, 2 }
 0x2a6   : > { %v1733_v1 = vadd.f32 %v2351_v33, %v1732_v15  ;;  %v1713_v59 = vrot.slane %v1712_v20, 4  ;;  %v1857_v25 = vrot.slane %v1856_v35, 2 }
 0x2a7   : > { %v1837_v46 = vadd.f32 %v1836_v28, %v1835_v50 }
 0x2a8   : > { %v1734_v5 = vrot.slane %v1733_v1, 4  ;;  %v1714_v16 = vadd.f32 %v1713_v59, %v1712_v20  ;;  %v1858_v12 = vadd.f32 %v1857_v25, %v1856_v35 }
 0x2a9   : > { %v1838_v18 = vrot.slane %v1837_v46, 1 }
 0x2aa   : > { %v1735_v56 = vadd.f32 %v1734_v5, %v1733_v1  ;;  %v1715_v26 = vrot.slane %v1714_v16, 2  ;;  %v1859_v49 = vrot.slane %v1858_v12, 1 }
 0x2ab   : > { %v1839_v19 = vadd.f32 %v1838_v18, %v1837_v46 }
 0x2ac   : > { %v1736_v11 = vrot.slane %v1735_v56, 2  ;;  %v1716_v17 = vadd.f32 %v1715_v26, %v1714_v16  ;;  %v1860_v8 = vadd.f32 %v1859_v49, %v1858_v12 }
 0x2ae   : > { %v1737_v7 = vadd.f32 %v1736_v11, %v1735_v56  ;;  %v1717_v22 = vrot.slane %v1716_v17, 1 }
 0x2b0   : > { %v1738_v60 = vrot.slane %v1737_v7, 1  ;;  %v1718_v63 = vadd.f32 %v1717_v22, %v1716_v17 }
 0x2b2   : > { %v1739_v39 = vadd.f32 %v1738_v60, %v1737_v7  ;;  %2352 = vlog2.f32 %v1718_v63 }
 0x2b4   : > { %2354 = vlog2.f32 %v1739_v39 }
 0x2bc   : > { %v2353_v21 = vpop.eup %2352 }
 0x2bd   : > { %v1741_v57 = vmul.f32 0.6931472, %v2353_v21 }
 0x2be   : > { %v2355_v31 = vpop.eup %2354 }
 0x2bf   : > { %v1743_v27 = vmul.f32 0.6931472, %v2355_v31  ;;  %v1744_v9 = vadd.f32 %v1741_v57, %v3679_v48 }
 0x2c1   : > { %v1745_v24 = vadd.f32 %v1743_v27, %v3681_v54  ;;  %v1862_v45 = vsub.f32 %v1744_v9, %v1839_v19 }
 0x2c3   : > { %v1863_v62 = vsub.f32 %v1745_v24, %v1860_v8 }
 0x2c5   : > { %v1866_v52 = vcombine.low %v1862_v45, %v1863_v62 }
 0x2c7   : > { %v1873_v58 = vrot.slane %v1866_v52, %v4324_v6 }
 0x2c9   : > { %v1880_v38 = vrot.slane %v1873_v58, %v4324_v6 }
 0x2cb   : > { %v1882_v29 = vsel %vm2679_vm7, %v1880_v38, 0.0 }
 0x2cc   : > { %v1883_v53 = vadd.f32 %v1882_v29, %v1861_v37 }
 0x2ce   : > { %1884 = vst.msk [vmem:[%s3166_s26] sm:$0x3] %vm3161_vm14, %v1883_v53 }
 0x2cf PF: > { %s2054_s6 = sshll.u32 %s2487_s23, 5  ;;  %s1900_s10 = sshll.u32 %s3166_s26, 4  ;;  %s1901_s10 = int_to_ptr.vmem [resolvable:$true] %s1900_s10 }
 0x2d0   : > { %s3963_s9 = scalar_lea.hbm %s4006_s4, %s2054_s6  ;;  %s1886_s11 = scalar_lea.sflag [#allocation6], %s2524_s12 }
 0x2d1   : > { %s2368_s13 = scalar_lea.vmem %s1901_s10, 32  ;;  %s2437_s14 = smov [#allocation5]  }
 0x2d2   : > { %p2369_p7 = scmp.ne.s32.totalorder %s1901_s10, %s2368_s13  ;;  %s2372_s15 = sshll.u32 %s2437_s14, 4  ;;  %s2373_s15 = int_to_ptr.vmem [resolvable:$false] %s2372_s15 }
 0x2d3   : > { %s2374_s16 = scalar_lea.vmem %s2373_s15, 64  ;;  %p2375_p10 = scmp.lt.s32.totalorder %s1901_s10, %s2373_s15 }
 0x2d4   : > { %p2370_p8 = pnand %p2369_p7, %p2505_p11  ;;  %p2376_p12 = scmp.lt.s32.totalorder %s2374_s16, %s2368_s13 }
 0x2d6   : > { %p2371_p9 = pneg %p2370_p8  ;;  %p2377_p1 = por %p2376_p12, %p2375_p10 }
 0x2d8   : > { %p2378_p2 = pnand %p2377_p1, %p2371_p9 }
 0x2da   : > { %2381 = shalt.err (!%p2378_p2)
}
 0x2db   : > { %s2382_s23 = scalar_lea.hbm %s3963_s9, 32  ;;  %s2386_s18 = scalar_lea.hbm %s4006_s4, 64 }
 0x2dc   : > { %p2383_p3 = scmp.ne.s32.totalorder %s3963_s9, %s2382_s23  ;;  %p2387_p6 = scmp.lt.u32.totalorder %s3963_s9, %s4006_s4 }
 0x2dd   : > { %p2388_p7 = scmp.lt.u32.totalorder %s2386_s18, %s2382_s23  ;;  %p2390_p9 = scmp.lt.u32.totalorder %s2382_s23, %s3963_s9 }
 0x2de   : > { %p2384_p4 = pnand %p2383_p3, %p2505_p11 }
 0x2df   : > { %p2389_p8 = por %p2388_p7, %p2387_p6 }
 0x2e0   : > { %p2385_p5 = pneg %p2384_p4 }
 0x2e1   : > { %p2391_p10 = por %p2390_p9, %p2389_p8 }
 0x2e3   : > { %p2392_p12 = pnand %p2391_p10, %p2385_p5 }
 0x2e5   : > { %2395 = shalt.err (!%p2392_p12)
}
 0x2e6   : > { %2067 = dma.vmem_to_hbm [thread:$0]  (%p2505_p11), %s1901_s10, 32, %s3963_s9, %s1886_s11  }
 0x2e7 PF: > { %s1912_s26 = sand.u32 1, %s2420_s20   ;;  %p2070_p1 = pnand %p1976_p0, %p2509_p13 }
 0x2e8   : > { %s1913_s27 = scalar_lea.sflag [#allocation6], %s1912_s26 }
 0x2e9   : > { %2415 = dma.done.wait (!%p2070_p1), %s1913_s27, 32  }
 0x2ea   : > { %2417 = vsyncadd (!%p2070_p1), %s1913_s27, 4294967264  ;;  %p20_p2 = scmp.ge.s32.totalorder %s2491_s25, 4   ;;  %s4327_s20 = smov %s2424_s21 }
 0x2eb   : > { %s4328_s21 = smov %s2428_s0  ;;  %s4329_s0 = smov %s2503_s28 }
 0x2ec   : > { %s4330_s22 = smov %s2491_s25  ;;  %22 = sbr.rel (!%p20_p2) target bundleno = 18 (0x12), region = 121 }
 0x2f3   :  { %1918 = vsyncpa [#allocation6], 1 }
 0x2f4   :  { %1920 = vsyncpa [#allocation6 + $0x1], 1 }

</bundles_post_ra>
